<compile_context>
chip_gen: v7x
topology: tpu7x:2x2x1
jax: 0.10.0
libtpu: 0.0.40
codegen_flags: <defaults>
</compile_context>

<pallas_src>
import functools

import numpy as np
import jax
import jax.numpy as jnp
from jax import lax
from jax.experimental import pallas as pl
from jax.experimental.pallas import tpu as pltpu


def _round_up(x, m):
    return ((x + m - 1) // m) * m


def _periodic_loss_kernel(preds_ref, fs_ref, basis_ref, out_ref, *,
                          k_bins, band_lo, band_hi, delta_param):
    # ---- hot path: real DFT via one fused MXU matmul (f32 accumulation) ------
    x = preds_ref[...]                                            # (TB, T)
    y = jnp.dot(x, basis_ref[...],
                preferred_element_type=jnp.float32)               # (TB, 2*Kp) f32

    TB, two_kp = y.shape
    Kp = two_kp // 2
    re = y[:, :Kp]                                                # lane-aligned slices
    im = y[:, Kp:]
    psd = re * re + im * im                                       # |rfft|^2, (TB, Kp) f32

    K = k_bins                                                    # real #bins (<= Kp)
    # (1, Kp) iota; comparisons broadcast against (TB, 1) thresholds.
    k_idx = lax.broadcasted_iota(jnp.int32, (1, Kp), 1)

    fs = fs_ref[...].astype(jnp.float32)                          # (TB, 1)
    half = fs * 0.5                                               # Fs / 2

    # Closed-form band edges on the uniform grid freq[k] = (Fs/2) * k / (K-1).
    # ceil(x - 0.5) == round-half-toward-lower-index, matching torch.argmin's
    # first-index tie-break exactly.
    scale = float(K - 1) / half                                   # (TB, 1)
    left = jnp.clip(jnp.ceil(band_lo * scale - 0.5), 0, K - 1).astype(jnp.int32)
    right = jnp.clip(jnp.ceil(band_hi * scale - 0.5), 0, K - 1).astype(jnp.int32)

    in_band = (k_idx >= left) & (k_idx < right)                   # (TB, Kp) bool

    # ---- band loss (reuse reductions: out_band = total - in_band_sum) --------
    total = jnp.sum(psd, axis=1, keepdims=True)
    psd_in = jnp.where(in_band, psd, 0.0)
    in_sum = jnp.sum(psd_in, axis=1, keepdims=True)
    band_loss = (total - in_sum) / (1e-8 + total)                 # padded rows -> 0

    # ---- sparse loss ----------------------------------------------------------
    # first argmax of psd within [left, right)
    mx = jnp.max(psd_in, axis=1, keepdims=True)
    peak = jnp.min(jnp.where(in_band & (psd == mx), k_idx, Kp),
                   axis=1, keepdims=True)                         # (TB, 1) int32

    # NOTE: step = (Fs/2)/K faithfully replicates the reference's len(freq)=K
    # spacing (true grid spacing would be (Fs/2)/(K-1)).  Do not "fix".
    step = half / float(K)
    delta = jnp.maximum(1.0, jnp.round(delta_param / step)).astype(jnp.int32)

    up1 = peak - delta
    up1 = jnp.where(up1 < 0, K + up1, up1)   # Python negative-stop slice semantics (len K)
    lo2 = peak + delta

    # Additive indicators (NOT logical OR): when the wrapped window overlaps
    # [lo2, right) the reference double-counts those bins; keep exact parity.
    w = ((k_idx >= left) & (k_idx < up1)).astype(jnp.float32) \
        + ((k_idx >= lo2) & (k_idx < right)).astype(jnp.float32)
    num = jnp.sum(psd * w, axis=1, keepdims=True)
    den = in_sum + 1e-8 * (right - left).astype(jnp.float32)
    sparse_loss = num / den                                       # padded rows -> 0

    # ---- per-tile partial sums, lane-dense (8, 128) output slab ---------------
    band_sum = jnp.sum(band_loss, axis=0, keepdims=True)          # (1, 1)
    sparse_sum = jnp.sum(sparse_loss, axis=0, keepdims=True)      # (1, 1)
    lane = lax.broadcasted_iota(jnp.int32, (8, 128), 1)
    out_ref[...] = jnp.where(lane == 0, band_sum,
                             jnp.where(lane == 1, sparse_sum, 0.0))


def periodic_loss_diff_fs(preds, fs, *, n_fft=1024, delta=6.0,
                          pulse_band=(40 / 60.0, 180 / 60.0),
                          weights=(1.0, 1.0, 1.0),
                          matmul_dtype=jnp.bfloat16,
                          batch_tile=256):
    """JAX/Pallas equivalent of PeriodicLoss_diffFs.forward(preds, Fs).

    Default matmul_dtype=jnp.bfloat16: MXU-rate DFT with f32 accumulation;
    post-matmul masking/reduction math is always f32.  Pass jnp.float32 for the
    bit-accurate (slower, emulated-f32-MXU) path.
    """
    B, T = preds.shape
    K = n_fft // 2 + 1
    K_pad = _round_up(K, 128)                 # lane-align the frequency axis
    itemsize = np.dtype(matmul_dtype).itemsize

    # ---- fused DFT basis [cos | sin], zero-padded columns (host-side, once) ---
    # K=513 -> K_pad=640 wastes ~20% MXU columns; accepted (zero columns), only
    # worth revisiting if the matmul is confirmed as the binding unit.
    t = np.arange(T, dtype=np.float64)[:, None]
    k = np.arange(K, dtype=np.float64)[None, :]
    ang = 2.0 * np.pi * t * k / float(n_fft)
    basis_np = np.zeros((T, 2 * K_pad), dtype=np.float64)
    basis_np[:, :K] = np.cos(ang)
    basis_np[:, K_pad:K_pad + K] = np.sin(ang)
    # TODO(synk): on v7x an fp8(e4m3) basis would halve resident VMEM again; needs an accuracy gate.
    basis = jnp.asarray(basis_np, dtype=matmul_dtype)             # (T, 2*K_pad)

    # ---- batch tiling ----------------------------------------------------------
    # bf16 packs 16 rows per vreg -> align TB to 16 (8 for f32).  Cap TB so the
    # grid keeps >= 2 steps whenever the batch allows (feeds both v7x TensorCores).
    row_align = 8 * max(1, 4 // itemsize)
    TB = min(_round_up(int(batch_tile), row_align), _round_up(B, row_align))
    if B > row_align:
        TB = min(TB, _round_up(pl.cdiv(B, 2), row_align))
    B_pad = _round_up(B, TB)
    n_tiles = B_pad // TB

    # Skip the host-side pad/copy when the batch already tiles evenly.
    preds_cast = preds.astype(matmul_dtype)
    if B_pad == B:
        preds_p = preds_cast
    else:
        preds_p = jnp.zeros((B_pad, T), matmul_dtype).at[:B].set(preds_cast)
    fs_vec = jnp.reshape(fs, (B,)).astype(jnp.float32)
    if B_pad == B:
        fs_p = fs_vec[:, None]
    else:
        # Padded rows get a benign Fs (left<right, den>0); their losses are exactly 0.
        fs_p = jnp.full((B_pad, 1), 30.0, jnp.float32).at[:B, 0].set(fs_vec)

    kernel = functools.partial(
        _periodic_loss_kernel,
        k_bins=K,
        band_lo=float(pulse_band[0]),
        band_hi=float(pulse_band[1]),
        delta_param=float(delta) / 60.0)

    # Per-core VMEM capacity (clamp requests under it, esp. on 64 MiB/TC v7x).
    try:
        vmem_cap = int(pltpu.get_tpu_info().vmem_capacity_bytes)
    except Exception:
        vmem_cap = 64 * (1 << 20)

    def _call(single_buffer_basis):
        basis_bufs = 1 if single_buffer_basis else 2
        need = (2 * TB * T * itemsize                     # preds block (double-buffered)
                + basis_bufs * T * 2 * K_pad * itemsize   # resident DFT basis
                + 2 * TB * 128 * 4                        # Fs block (lane-padded)
                + 2 * 8 * 128 * 4                         # output partial-sum slab
                + 10 * TB * K_pad * 4)                    # f32 intermediates headroom
        vmem_limit = int(min(int(0.85 * vmem_cap), max(32 << 20, 2 * need)))
        if single_buffer_basis:
            basis_spec = pl.BlockSpec((T, 2 * K_pad), lambda i: (0, 0),
                                      pipeline_mode=pl.Buffered(1))
        else:
            basis_spec = pl.BlockSpec((T, 2 * K_pad), lambda i: (0, 0))
        return pl.pallas_call(
            kernel,
            grid=(n_tiles,),
            in_specs=[
                pl.BlockSpec((TB, T), lambda i: (i, 0)),          # preds: streamed
                pl.BlockSpec((TB, 1), lambda i: (i, 0)),          # Fs per row
                basis_spec,                                       # basis: resident
            ],
            out_specs=pl.BlockSpec((8, 128), lambda i: (i, 0)),
            out_shape=jax.ShapeDtypeStruct((n_tiles * 8, 128), jnp.float32),
            compiler_params=pltpu.CompilerParams(
                dimension_semantics=("parallel",),
                vmem_limit_bytes=vmem_limit),
        )(preds_p, fs_p, basis)

    try:
        out = _call(True)           # single-buffered resident basis
    except Exception:
        out = _call(False)          # fallback: default double-buffered basis

    out3 = out.reshape(n_tiles, 8, 128)
    band_mean = jnp.sum(out3[:, 0, 0]) / B
    sparse_mean = jnp.sum(out3[:, 0, 1]) / B
    # weights[2] unused, as in the torch module.
    return weights[0] * band_mean + weights[1] * sparse_mean


def _reference(preds, fs, *, n_fft, delta, pulse_band, weights):
    """NumPy re-implementation of the torch forward (sanity check only)."""
    preds = np.asarray(preds, np.float32)
    fs = np.asarray(fs, np.float32)
    K = n_fft // 2 + 1
    band_l, sparse_l = [], []
    for i in range(preds.shape[0]):
        freq = np.linspace(0.0, fs[i] / 2.0, K, dtype=np.float32)
        left = int(np.argmin(np.abs(freq - pulse_band[0])))
        right = int(np.argmin(np.abs(freq - pulse_band[1])))
        psd = np.abs(np.fft.rfft(preds[i], n=n_fft)) ** 2
        band_l.append((psd[:left].sum() + psd[right:].sum()) / (1e-8 + psd.sum()))
        peak = int(np.argmax(psd[left:right])) + left
        d = max(1, round((delta / 60.0) / float(fs[i] / 2.0 / K)))
        sparse_l.append((psd[left:peak - d].sum() + psd[peak + d:right].sum())
                        / (psd[left:right] + 1e-08).sum())
    return weights[0] * float(np.mean(band_l)) + weights[1] * float(np.mean(sparse_l))


if __name__ == "__main__":
    # Small deterministic example: batch of 4 signals, 128 samples each,
    # FFT length N=256, per-sample sampling rates around 30 Hz.
    B, T, N = 4, 128, 256
    key = jax.random.PRNGKey(0)
    k1, k2, k3 = jax.random.split(key, 3)
    fs = 25.0 + 10.0 * jax.random.uniform(k1, (B,), dtype=jnp.float32)       # ~[25, 35] Hz
    # Per-row pulse frequency inside the band, snapped to an exact N-point bin of
    # that row's Fs so the in-band peak is unambiguous (robust under bf16).
    f_tgt = 1.0 + 1.5 * jax.random.uniform(k2, (B,), dtype=jnp.float32)      # [1.0, 2.5] Hz
    f_sig = jnp.round(f_tgt * N / fs) * fs / N
    tt = jnp.arange(T, dtype=jnp.float32)
    preds = jnp.cos(2.0 * jnp.pi * f_sig[:, None] * tt[None, :] / fs[:, None])
    preds = preds + 0.02 * jax.random.normal(k3, (B, T), dtype=jnp.float32)

    # Accurate path (f32 MXU operands) vs the numpy/torch-equivalent reference.
    out_f32 = periodic_loss_diff_fs(preds, fs, n_fft=N, delta=6.0,
                                    matmul_dtype=jnp.float32)
    out_f32 = jax.block_until_ready(out_f32)
    ref = _reference(np.array(preds), np.array(fs), n_fft=N, delta=6.0,
                     pulse_band=(40 / 60.0, 180 / 60.0), weights=(1.0, 1.0, 1.0))
    np.testing.assert_allclose(float(out_f32), ref, rtol=2e-3, atol=2e-4)

    # Default throughput path (bf16 MXU operands, f32 epilogue): tolerance vs f32.
    out_bf16 = periodic_loss_diff_fs(preds, fs, n_fft=N, delta=6.0)
    out_bf16 = jax.block_until_ready(out_bf16)
    assert np.isfinite(float(out_bf16))
    np.testing.assert_allclose(float(out_bf16), float(out_f32), rtol=0.1, atol=0.02)

    print("KERNEL_OK")
</pallas_src>

<mosaic_0001>
module attributes {stable_mosaic.version = 11 : i64} {
  func.func @_periodic_loss_kernel(%arg0: i32, %arg1: memref<8x128xf32, #tpu.memory_space<vmem>>, %arg2: memref<8x1xf32, #tpu.memory_space<vmem>>, %arg3: memref<128x512xf32, #tpu.memory_space<vmem>>, %arg4: memref<8x128xf32, #tpu.memory_space<vmem>>) attributes {dimension_semantics = [#tpu.dimension_semantics<parallel>], iteration_bounds = array<i64: 1>, scalar_prefetch = 0 : i64, scratch_operands = 0 : i64, tpu.core_type = #tpu.core_type<tc>, window_params = [{transform_indices = @transform_0, window_bounds = array<i64: 8, 128>}, {transform_indices = @transform_1, window_bounds = array<i64: 8, 1>}, {pipeline_mode = #tpu.pipeline_mode<synchronous>, transform_indices = @transform_2, window_bounds = array<i64: 128, 512>}, {transform_indices = @transform_3, window_bounds = array<i64: 8, 128>}]} {
    %c0 = arith.constant 0 : index
    %c0_0 = arith.constant 0 : index
    %0 = vector.load %arg1[%c0, %c0_0] : memref<8x128xf32, #tpu.memory_space<vmem>>, vector<8x128xf32>
    %c0_1 = arith.constant 0 : index
    %c0_2 = arith.constant 0 : index
    %1 = vector.load %arg3[%c0_1, %c0_2] : memref<128x512xf32, #tpu.memory_space<vmem>>, vector<128x512xf32>
    %cst = arith.constant dense<0.000000e+00> : vector<8x512xf32>
    %2 = tpu.matmul %0, %1, %cst {dimension_numbers = #tpu.dot_dimension_numbers<[1], [0], [0], [1], [0, 0, 1, 1], [], []>} : vector<8x128xf32>, vector<128x512xf32>, vector<8x512xf32> -> vector<8x512xf32>
    %3 = vector.extract_strided_slice %2 {offsets = [0, 0], sizes = [8, 256], strides = [1, 1]} : vector<8x512xf32> to vector<8x256xf32>
    %4 = vector.extract_strided_slice %2 {offsets = [0, 256], sizes = [8, 256], strides = [1, 1]} : vector<8x512xf32> to vector<8x256xf32>
    %5 = arith.mulf %3, %3 : vector<8x256xf32>
    %6 = arith.mulf %4, %4 : vector<8x256xf32>
    %7 = arith.addf %5, %6 : vector<8x256xf32>
    %8 = tpu.iota {dimensions = array<i32: 1>} : vector<1x256xi32>
    %c0_3 = arith.constant 0 : index
    %c0_4 = arith.constant 0 : index
    %9 = vector.load %arg2[%c0_3, %c0_4] : memref<8x1xf32, #tpu.memory_space<vmem>>, vector<8x1xf32>
    %cst_5 = arith.constant 5.000000e-01 : f32
    %10 = vector.broadcast %cst_5 : f32 to vector<8x1xf32>
    %11 = arith.mulf %9, %10 : vector<8x1xf32>
    %cst_6 = arith.constant 1.280000e+02 : f32
    %12 = vector.broadcast %cst_6 : f32 to vector<8x1xf32>
    %13 = arith.divf %12, %11 : vector<8x1xf32>
    %cst_7 = arith.constant 0.666666686 : f32
    %14 = vector.broadcast %cst_7 : f32 to vector<8x1xf32>
    %15 = arith.mulf %14, %13 : vector<8x1xf32>
    %cst_8 = arith.constant 5.000000e-01 : f32
    %16 = vector.broadcast %cst_8 : f32 to vector<8x1xf32>
    %17 = arith.subf %15, %16 : vector<8x1xf32>
    %18 = math.ceil %17 : vector<8x1xf32>
    %c0_i32 = arith.constant 0 : i32
    %c128_i32 = arith.constant 128 : i32
    %19 = arith.sitofp %c0_i32 : i32 to f32
    %20 = vector.broadcast %19 : f32 to vector<8x1xf32>
    %21 = arith.maximumf %20, %18 : vector<8x1xf32>
    %22 = arith.sitofp %c128_i32 : i32 to f32
    %23 = vector.broadcast %22 : f32 to vector<8x1xf32>
    %24 = arith.minimumf %23, %21 : vector<8x1xf32>
    %25 = arith.fptosi %24 : vector<8x1xf32> to vector<8x1xi32>
    %cst_9 = arith.constant 3.000000e+00 : f32
    %26 = vector.broadcast %cst_9 : f32 to vector<8x1xf32>
    %27 = arith.mulf %26, %13 : vector<8x1xf32>
    %cst_10 = arith.constant 5.000000e-01 : f32
    %28 = vector.broadcast %cst_10 : f32 to vector<8x1xf32>
    %29 = arith.subf %27, %28 : vector<8x1xf32>
    %30 = math.ceil %29 : vector<8x1xf32>
    %c0_i32_11 = arith.constant 0 : i32
    %c128_i32_12 = arith.constant 128 : i32
    %31 = arith.sitofp %c0_i32_11 : i32 to f32
    %32 = vector.broadcast %31 : f32 to vector<8x1xf32>
    %33 = arith.maximumf %32, %30 : vector<8x1xf32>
    %34 = arith.sitofp %c128_i32_12 : i32 to f32
    %35 = vector.broadcast %34 : f32 to vector<8x1xf32>
    %36 = arith.minimumf %35, %33 : vector<8x1xf32>
    %37 = arith.fptosi %36 : vector<8x1xf32> to vector<8x1xi32>
    %38 = vector.broadcast %8 : vector<1x256xi32> to vector<8x256xi32>
    %39 = vector.broadcast %25 : vector<8x1xi32> to vector<8x256xi32>
    %40 = arith.cmpi sge, %38, %39 : vector<8x256xi32>
    %41 = vector.broadcast %8 : vector<1x256xi32> to vector<8x256xi32>
    %42 = vector.broadcast %37 : vector<8x1xi32> to vector<8x256xi32>
    %43 = arith.cmpi slt, %41, %42 : vector<8x256xi32>
    %44 = arith.andi %40, %43 : vector<8x256xi1>
    %cst_13 = arith.constant dense<0.000000e+00> : vector<8xf32>
    %45 = vector.multi_reduction <add>, %7, %cst_13 [1] : vector<8x256xf32> to vector<8xf32>
    %46 = vector.shape_cast %45 : vector<8xf32> to vector<8x1xf32>
    %cst_14 = arith.constant 0.000000e+00 : f32
    %47 = vector.broadcast %cst_14 : f32 to vector<8x256xf32>
    %48 = arith.select %44, %7, %47 : vector<8x256xi1>, vector<8x256xf32>
    %cst_15 = arith.constant dense<0.000000e+00> : vector<8xf32>
    %49 = vector.multi_reduction <add>, %48, %cst_15 [1] : vector<8x256xf32> to vector<8xf32>
    %50 = vector.shape_cast %49 : vector<8xf32> to vector<8x1xf32>
    %51 = arith.subf %46, %50 : vector<8x1xf32>
    %cst_16 = arith.constant 9.99999993E-9 : f32
    %52 = vector.broadcast %cst_16 : f32 to vector<8x1xf32>
    %53 = arith.addf %52, %46 : vector<8x1xf32>
    %54 = arith.divf %51, %53 : vector<8x1xf32>
    %cst_17 = arith.constant dense<0xFF800000> : vector<8xf32>
    %55 = vector.multi_reduction <maximumf>, %48, %cst_17 [1] : vector<8x256xf32> to vector<8xf32>
    %56 = vector.shape_cast %55 : vector<8xf32> to vector<8x1xf32>
    %57 = vector.broadcast %56 : vector<8x1xf32> to vector<8x256xf32>
    %58 = arith.cmpf oeq, %7, %57 : vector<8x256xf32>
    %59 = arith.andi %44, %58 : vector<8x256xi1>
    %c256_i32 = arith.constant 256 : i32
    %60 = vector.shape_cast %8 : vector<1x256xi32> to vector<1x256xi32>
    %61 = vector.broadcast %60 : vector<1x256xi32> to vector<8x256xi32>
    %62 = vector.broadcast %c256_i32 : i32 to vector<8x256xi32>
    %63 = arith.select %59, %61, %62 : vector<8x256xi1>, vector<8x256xi32>
    %cst_18 = arith.constant dense<2147483647> : vector<8xi32>
    %64 = vector.multi_reduction <minsi>, %63, %cst_18 [1] : vector<8x256xi32> to vector<8xi32>
    %65 = vector.shape_cast %64 : vector<8xi32> to vector<8x1xi32>
    %cst_19 = arith.constant 1.290000e+02 : f32
    %66 = vector.broadcast %cst_19 : f32 to vector<8x1xf32>
    %67 = arith.divf %11, %66 : vector<8x1xf32>
    %cst_20 = arith.constant 1.000000e-01 : f32
    %68 = vector.broadcast %cst_20 : f32 to vector<8x1xf32>
    %69 = arith.divf %68, %67 : vector<8x1xf32>
    %70 = math.roundeven %69 : vector<8x1xf32>
    %cst_21 = arith.constant 1.000000e+00 : f32
    %71 = vector.broadcast %cst_21 : f32 to vector<8x1xf32>
    %72 = arith.maximumf %71, %70 : vector<8x1xf32>
    %73 = arith.fptosi %72 : vector<8x1xf32> to vector<8x1xi32>
    %74 = arith.subi %65, %73 : vector<8x1xi32>
    %c0_i32_22 = arith.constant 0 : i32
    %75 = vector.broadcast %c0_i32_22 : i32 to vector<8x1xi32>
    %76 = arith.cmpi slt, %74, %75 : vector<8x1xi32>
    %c129_i32 = arith.constant 129 : i32
    %77 = vector.broadcast %c129_i32 : i32 to vector<8x1xi32>
    %78 = arith.addi %77, %74 : vector<8x1xi32>
    %79 = arith.select %76, %78, %74 : vector<8x1xi1>, vector<8x1xi32>
    %80 = arith.addi %65, %73 : vector<8x1xi32>
    %81 = vector.broadcast %8 : vector<1x256xi32> to vector<8x256xi32>
    %82 = vector.broadcast %25 : vector<8x1xi32> to vector<8x256xi32>
    %83 = arith.cmpi sge, %81, %82 : vector<8x256xi32>
    %84 = vector.broadcast %8 : vector<1x256xi32> to vector<8x256xi32>
    %85 = vector.broadcast %79 : vector<8x1xi32> to vector<8x256xi32>
    %86 = arith.cmpi slt, %84, %85 : vector<8x256xi32>
    %87 = arith.andi %83, %86 : vector<8x256xi1>
    %88 = arith.extui %87 : vector<8x256xi1> to vector<8x256xi32>
    %89 = arith.sitofp %88 : vector<8x256xi32> to vector<8x256xf32>
    %90 = vector.broadcast %8 : vector<1x256xi32> to vector<8x256xi32>
    %91 = vector.broadcast %80 : vector<8x1xi32> to vector<8x256xi32>
    %92 = arith.cmpi sge, %90, %91 : vector<8x256xi32>
    %93 = vector.broadcast %8 : vector<1x256xi32> to vector<8x256xi32>
    %94 = vector.broadcast %37 : vector<8x1xi32> to vector<8x256xi32>
    %95 = arith.cmpi slt, %93, %94 : vector<8x256xi32>
    %96 = arith.andi %92, %95 : vector<8x256xi1>
    %97 = arith.extui %96 : vector<8x256xi1> to vector<8x256xi32>
    %98 = arith.sitofp %97 : vector<8x256xi32> to vector<8x256xf32>
    %99 = arith.addf %89, %98 : vector<8x256xf32>
    %100 = arith.mulf %7, %99 : vector<8x256xf32>
    %cst_23 = arith.constant dense<0.000000e+00> : vector<8xf32>
    %101 = vector.multi_reduction <add>, %100, %cst_23 [1] : vector<8x256xf32> to vector<8xf32>
    %102 = vector.shape_cast %101 : vector<8xf32> to vector<8x1xf32>
    %103 = arith.subi %37, %25 : vector<8x1xi32>
    %104 = arith.sitofp %103 : vector<8x1xi32> to vector<8x1xf32>
    %cst_24 = arith.constant 9.99999993E-9 : f32
    %105 = vector.broadcast %cst_24 : f32 to vector<8x1xf32>
    %106 = arith.mulf %105, %104 : vector<8x1xf32>
    %107 = arith.addf %50, %106 : vector<8x1xf32>
    %108 = arith.divf %102, %107 : vector<8x1xf32>
    %cst_25 = arith.constant dense<0.000000e+00> : vector<1xf32>
    %109 = vector.multi_reduction <add>, %54, %cst_25 [0] : vector<8x1xf32> to vector<1xf32>
    %110 = vector.shape_cast %109 : vector<1xf32> to vector<1x1xf32>
    %cst_26 = arith.constant dense<0.000000e+00> : vector<1xf32>
    %111 = vector.multi_reduction <add>, %108, %cst_26 [0] : vector<8x1xf32> to vector<1xf32>
    %112 = vector.shape_cast %111 : vector<1xf32> to vector<1x1xf32>
    %113 = tpu.iota {dimensions = array<i32: 1>} : vector<8x128xi32>
    %c0_i32_27 = arith.constant 0 : i32
    %114 = vector.broadcast %c0_i32_27 : i32 to vector<8x128xi32>
    %115 = arith.cmpi eq, %113, %114 : vector<8x128xi32>
    %c1_i32 = arith.constant 1 : i32
    %116 = vector.broadcast %c1_i32 : i32 to vector<8x128xi32>
    %117 = arith.cmpi eq, %113, %116 : vector<8x128xi32>
    %cst_28 = arith.constant 0.000000e+00 : f32
    %118 = vector.shape_cast %112 : vector<1x1xf32> to vector<1x1xf32>
    %119 = vector.broadcast %118 : vector<1x1xf32> to vector<8x128xf32>
    %120 = vector.broadcast %cst_28 : f32 to vector<8x128xf32>
    %121 = arith.select %117, %119, %120 : vector<8x128xi1>, vector<8x128xf32>
    %122 = vector.shape_cast %110 : vector<1x1xf32> to vector<1x1xf32>
    %123 = vector.broadcast %122 : vector<1x1xf32> to vector<8x128xf32>
    %124 = arith.select %115, %123, %121 : vector<8x128xi1>, vector<8x128xf32>
    %c0_29 = arith.constant 0 : index
    %c0_30 = arith.constant 0 : index
    %125 = vector.load %arg4[%c0_29, %c0_30] : memref<8x128xf32, #tpu.memory_space<vmem>>, vector<8x128xf32>
    tpu.vector_store %arg4[%c0_29, %c0_30], %124 {strides = array<i32>} : memref<8x128xf32, #tpu.memory_space<vmem>>, vector<8x128xf32>,
    return
  }
  func.func @transform_0(%arg0: i32) -> (i32, i32) {
    %c0_i32 = arith.constant 0 : i32
    %c0_i32_0 = arith.constant 0 : i32
    return %arg0, %c0_i32 : i32, i32
  }
  func.func @transform_1(%arg0: i32) -> (i32, i32) {
    %c0_i32 = arith.constant 0 : i32
    %c0_i32_0 = arith.constant 0 : i32
    return %arg0, %c0_i32 : i32, i32
  }
  func.func @transform_2(%arg0: i32) -> (i32, i32) {
    %c0_i32 = arith.constant 0 : i32
    %c0_i32_0 = arith.constant 0 : i32
    %c0_i32_1 = arith.constant 0 : i32
    return %c0_i32, %c0_i32_0 : i32, i32
  }
  func.func @transform_3(%arg0: i32) -> (i32, i32) {
    %c0_i32 = arith.constant 0 : i32
    %c0_i32_0 = arith.constant 0 : i32
    return %arg0, %c0_i32 : i32, i32
  }
}

module attributes {stable_mosaic.version = 11 : i64} {
  func.func @_periodic_loss_kernel(%arg0: i32, %arg1: memref<8x128xf32, #tpu.memory_space<vmem>>, %arg2: memref<8x1xf32, #tpu.memory_space<vmem>>, %arg3: memref<128x512xf32, #tpu.memory_space<vmem>>, %arg4: memref<8x128xf32, #tpu.memory_space<vmem>>) attributes {dimension_semantics = [#tpu.dimension_semantics<parallel>], iteration_bounds = array<i64: 1>, scalar_prefetch = 0 : i64, scratch_operands = 0 : i64, tpu.core_type = #tpu.core_type<tc>, window_params = [{transform_indices = @transform_0, window_bounds = array<i64: 8, 128>}, {transform_indices = @transform_1, window_bounds = array<i64: 8, 1>}, {pipeline_mode = #tpu.pipeline_mode<synchronous>, transform_indices = @transform_2, window_bounds = array<i64: 128, 512>}, {transform_indices = @transform_3, window_bounds = array<i64: 8, 128>}]} {
    %c0 = arith.constant 0 : index
    %c0_0 = arith.constant 0 : index
    %0 = vector.load %arg1[%c0, %c0_0] : memref<8x128xf32, #tpu.memory_space<vmem>>, vector<8x128xf32>
    %c0_1 = arith.constant 0 : index
    %c0_2 = arith.constant 0 : index
    %1 = vector.load %arg3[%c0_1, %c0_2] : memref<128x512xf32, #tpu.memory_space<vmem>>, vector<128x512xf32>
    %cst = arith.constant dense<0.000000e+00> : vector<8x512xf32>
    %2 = tpu.matmul %0, %1, %cst {dimension_numbers = #tpu.dot_dimension_numbers<[1], [0], [0], [1], [0, 0, 1, 1], [], []>} : vector<8x128xf32>, vector<128x512xf32>, vector<8x512xf32> -> vector<8x512xf32>
    %3 = vector.extract_strided_slice %2 {offsets = [0, 0], sizes = [8, 256], strides = [1, 1]} : vector<8x512xf32> to vector<8x256xf32>
    %4 = vector.extract_strided_slice %2 {offsets = [0, 256], sizes = [8, 256], strides = [1, 1]} : vector<8x512xf32> to vector<8x256xf32>
    %5 = arith.mulf %3, %3 : vector<8x256xf32>
    %6 = arith.mulf %4, %4 : vector<8x256xf32>
    %7 = arith.addf %5, %6 : vector<8x256xf32>
    %8 = tpu.iota {dimensions = array<i32: 1>} : vector<1x256xi32>
    %c0_3 = arith.constant 0 : index
    %c0_4 = arith.constant 0 : index
    %9 = vector.load %arg2[%c0_3, %c0_4] : memref<8x1xf32, #tpu.memory_space<vmem>>, vector<8x1xf32>
    %cst_5 = arith.constant 5.000000e-01 : f32
    %10 = vector.broadcast %cst_5 : f32 to vector<8x1xf32>
    %11 = arith.mulf %9, %10 : vector<8x1xf32>
    %cst_6 = arith.constant 1.280000e+02 : f32
    %12 = vector.broadcast %cst_6 : f32 to vector<8x1xf32>
    %13 = arith.divf %12, %11 : vector<8x1xf32>
    %cst_7 = arith.constant 0.666666686 : f32
    %14 = vector.broadcast %cst_7 : f32 to vector<8x1xf32>
    %15 = arith.mulf %14, %13 : vector<8x1xf32>
    %cst_8 = arith.constant 5.000000e-01 : f32
    %16 = vector.broadcast %cst_8 : f32 to vector<8x1xf32>
    %17 = arith.subf %15, %16 : vector<8x1xf32>
    %18 = math.ceil %17 : vector<8x1xf32>
    %c0_i32 = arith.constant 0 : i32
    %c128_i32 = arith.constant 128 : i32
    %19 = arith.sitofp %c0_i32 : i32 to f32
    %20 = vector.broadcast %19 : f32 to vector<8x1xf32>
    %21 = arith.maximumf %20, %18 : vector<8x1xf32>
    %22 = arith.sitofp %c128_i32 : i32 to f32
    %23 = vector.broadcast %22 : f32 to vector<8x1xf32>
    %24 = arith.minimumf %23, %21 : vector<8x1xf32>
    %25 = arith.fptosi %24 : vector<8x1xf32> to vector<8x1xi32>
    %cst_9 = arith.constant 3.000000e+00 : f32
    %26 = vector.broadcast %cst_9 : f32 to vector<8x1xf32>
    %27 = arith.mulf %26, %13 : vector<8x1xf32>
    %cst_10 = arith.constant 5.000000e-01 : f32
    %28 = vector.broadcast %cst_10 : f32 to vector<8x1xf32>
    %29 = arith.subf %27, %28 : vector<8x1xf32>
    %30 = math.ceil %29 : vector<8x1xf32>
    %c0_i32_11 = arith.constant 0 : i32
    %c128_i32_12 = arith.constant 128 : i32
    %31 = arith.sitofp %c0_i32_11 : i32 to f32
    %32 = vector.broadcast %31 : f32 to vector<8x1xf32>
    %33 = arith.maximumf %32, %30 : vector<8x1xf32>
    %34 = arith.sitofp %c128_i32_12 : i32 to f32
    %35 = vector.broadcast %34 : f32 to vector<8x1xf32>
    %36 = arith.minimumf %35, %33 : vector<8x1xf32>
    %37 = arith.fptosi %36 : vector<8x1xf32> to vector<8x1xi32>
    %38 = vector.broadcast %8 : vector<1x256xi32> to vector<8x256xi32>
    %39 = vector.broadcast %25 : vector<8x1xi32> to vector<8x256xi32>
    %40 = arith.cmpi sge, %38, %39 : vector<8x256xi32>
    %41 = vector.broadcast %8 : vector<1x256xi32> to vector<8x256xi32>
    %42 = vector.broadcast %37 : vector<8x1xi32> to vector<8x256xi32>
    %43 = arith.cmpi slt, %41, %42 : vector<8x256xi32>
    %44 = arith.andi %40, %43 : vector<8x256xi1>
    %cst_13 = arith.constant dense<0.000000e+00> : vector<8xf32>
    %45 = vector.multi_reduction <add>, %7, %cst_13 [1] : vector<8x256xf32> to vector<8xf32>
    %46 = vector.shape_cast %45 : vector<8xf32> to vector<8x1xf32>
    %cst_14 = arith.constant 0.000000e+00 : f32
    %47 = vector.broadcast %cst_14 : f32 to vector<8x256xf32>
    %48 = arith.select %44, %7, %47 : vector<8x256xi1>, vector<8x256xf32>
    %cst_15 = arith.constant dense<0.000000e+00> : vector<8xf32>
    %49 = vector.multi_reduction <add>, %48, %cst_15 [1] : vector<8x256xf32> to vector<8xf32>
    %50 = vector.shape_cast %49 : vector<8xf32> to vector<8x1xf32>
    %51 = arith.subf %46, %50 : vector<8x1xf32>
    %cst_16 = arith.constant 9.99999993E-9 : f32
    %52 = vector.broadcast %cst_16 : f32 to vector<8x1xf32>
    %53 = arith.addf %52, %46 : vector<8x1xf32>
    %54 = arith.divf %51, %53 : vector<8x1xf32>
    %cst_17 = arith.constant dense<0xFF800000> : vector<8xf32>
    %55 = vector.multi_reduction <maximumf>, %48, %cst_17 [1] : vector<8x256xf32> to vector<8xf32>
    %56 = vector.shape_cast %55 : vector<8xf32> to vector<8x1xf32>
    %57 = vector.broadcast %56 : vector<8x1xf32> to vector<8x256xf32>
    %58 = arith.cmpf oeq, %7, %57 : vector<8x256xf32>
    %59 = arith.andi %44, %58 : vector<8x256xi1>
    %c256_i32 = arith.constant 256 : i32
    %60 = vector.shape_cast %8 : vector<1x256xi32> to vector<1x256xi32>
    %61 = vector.broadcast %60 : vector<1x256xi32> to vector<8x256xi32>
    %62 = vector.broadcast %c256_i32 : i32 to vector<8x256xi32>
    %63 = arith.select %59, %61, %62 : vector<8x256xi1>, vector<8x256xi32>
    %cst_18 = arith.constant dense<2147483647> : vector<8xi32>
    %64 = vector.multi_reduction <minsi>, %63, %cst_18 [1] : vector<8x256xi32> to vector<8xi32>
    %65 = vector.shape_cast %64 : vector<8xi32> to vector<8x1xi32>
    %cst_19 = arith.constant 1.290000e+02 : f32
    %66 = vector.broadcast %cst_19 : f32 to vector<8x1xf32>
    %67 = arith.divf %11, %66 : vector<8x1xf32>
    %cst_20 = arith.constant 1.000000e-01 : f32
    %68 = vector.broadcast %cst_20 : f32 to vector<8x1xf32>
    %69 = arith.divf %68, %67 : vector<8x1xf32>
    %70 = math.roundeven %69 : vector<8x1xf32>
    %cst_21 = arith.constant 1.000000e+00 : f32
    %71 = vector.broadcast %cst_21 : f32 to vector<8x1xf32>
    %72 = arith.maximumf %71, %70 : vector<8x1xf32>
    %73 = arith.fptosi %72 : vector<8x1xf32> to vector<8x1xi32>
    %74 = arith.subi %65, %73 : vector<8x1xi32>
    %c0_i32_22 = arith.constant 0 : i32
    %75 = vector.broadcast %c0_i32_22 : i32 to vector<8x1xi32>
    %76 = arith.cmpi slt, %74, %75 : vector<8x1xi32>
    %c129_i32 = arith.constant 129 : i32
    %77 = vector.broadcast %c129_i32 : i32 to vector<8x1xi32>
    %78 = arith.addi %77, %74 : vector<8x1xi32>
    %79 = arith.select %76, %78, %74 : vector<8x1xi1>, vector<8x1xi32>
    %80 = arith.addi %65, %73 : vector<8x1xi32>
    %81 = vector.broadcast %8 : vector<1x256xi32> to vector<8x256xi32>
    %82 = vector.broadcast %25 : vector<8x1xi32> to vector<8x256xi32>
    %83 = arith.cmpi sge, %81, %82 : vector<8x256xi32>
    %84 = vector.broadcast %8 : vector<1x256xi32> to vector<8x256xi32>
    %85 = vector.broadcast %79 : vector<8x1xi32> to vector<8x256xi32>
    %86 = arith.cmpi slt, %84, %85 : vector<8x256xi32>
    %87 = arith.andi %83, %86 : vector<8x256xi1>
    %88 = arith.extui %87 : vector<8x256xi1> to vector<8x256xi32>
    %89 = arith.sitofp %88 : vector<8x256xi32> to vector<8x256xf32>
    %90 = vector.broadcast %8 : vector<1x256xi32> to vector<8x256xi32>
    %91 = vector.broadcast %80 : vector<8x1xi32> to vector<8x256xi32>
    %92 = arith.cmpi sge, %90, %91 : vector<8x256xi32>
    %93 = vector.broadcast %8 : vector<1x256xi32> to vector<8x256xi32>
    %94 = vector.broadcast %37 : vector<8x1xi32> to vector<8x256xi32>
    %95 = arith.cmpi slt, %93, %94 : vector<8x256xi32>
    %96 = arith.andi %92, %95 : vector<8x256xi1>
    %97 = arith.extui %96 : vector<8x256xi1> to vector<8x256xi32>
    %98 = arith.sitofp %97 : vector<8x256xi32> to vector<8x256xf32>
    %99 = arith.addf %89, %98 : vector<8x256xf32>
    %100 = arith.mulf %7, %99 : vector<8x256xf32>
    %cst_23 = arith.constant dense<0.000000e+00> : vector<8xf32>
    %101 = vector.multi_reduction <add>, %100, %cst_23 [1] : vector<8x256xf32> to vector<8xf32>
    %102 = vector.shape_cast %101 : vector<8xf32> to vector<8x1xf32>
    %103 = arith.subi %37, %25 : vector<8x1xi32>
    %104 = arith.sitofp %103 : vector<8x1xi32> to vector<8x1xf32>
    %cst_24 = arith.constant 9.99999993E-9 : f32
    %105 = vector.broadcast %cst_24 : f32 to vector<8x1xf32>
    %106 = arith.mulf %105, %104 : vector<8x1xf32>
    %107 = arith.addf %50, %106 : vector<8x1xf32>
    %108 = arith.divf %102, %107 : vector<8x1xf32>
    %cst_25 = arith.constant dense<0.000000e+00> : vector<1xf32>
    %109 = vector.multi_reduction <add>, %54, %cst_25 [0] : vector<8x1xf32> to vector<1xf32>
    %110 = vector.shape_cast %109 : vector<1xf32> to vector<1x1xf32>
    %cst_26 = arith.constant dense<0.000000e+00> : vector<1xf32>
    %111 = vector.multi_reduction <add>, %108, %cst_26 [0] : vector<8x1xf32> to vector<1xf32>
    %112 = vector.shape_cast %111 : vector<1xf32> to vector<1x1xf32>
    %113 = tpu.iota {dimensions = array<i32: 1>} : vector<8x128xi32>
    %c0_i32_27 = arith.constant 0 : i32
    %114 = vector.broadcast %c0_i32_27 : i32 to vector<8x128xi32>
    %115 = arith.cmpi eq, %113, %114 : vector<8x128xi32>
    %c1_i32 = arith.constant 1 : i32
    %116 = vector.broadcast %c1_i32 : i32 to vector<8x128xi32>
    %117 = arith.cmpi eq, %113, %116 : vector<8x128xi32>
    %cst_28 = arith.constant 0.000000e+00 : f32
    %118 = vector.shape_cast %112 : vector<1x1xf32> to vector<1x1xf32>
    %119 = vector.broadcast %118 : vector<1x1xf32> to vector<8x128xf32>
    %120 = vector.broadcast %cst_28 : f32 to vector<8x128xf32>
    %121 = arith.select %117, %119, %120 : vector<8x128xi1>, vector<8x128xf32>
    %122 = vector.shape_cast %110 : vector<1x1xf32> to vector<1x1xf32>
    %123 = vector.broadcast %122 : vector<1x1xf32> to vector<8x128xf32>
    %124 = arith.select %115, %123, %121 : vector<8x128xi1>, vector<8x128xf32>
    %c0_29 = arith.constant 0 : index
    %c0_30 = arith.constant 0 : index
    %125 = vector.load %arg4[%c0_29, %c0_30] : memref<8x128xf32, #tpu.memory_space<vmem>>, vector<8x128xf32>
    tpu.vector_store %arg4[%c0_29, %c0_30], %124 {strides = array<i32>} : memref<8x128xf32, #tpu.memory_space<vmem>>, vector<8x128xf32>,
    return
  }
  func.func @transform_0(%arg0: i32) -> (i32, i32) {
    %c0_i32 = arith.constant 0 : i32
    %c0_i32_0 = arith.constant 0 : i32
    return %arg0, %c0_i32 : i32, i32
  }
  func.func @transform_1(%arg0: i32) -> (i32, i32) {
    %c0_i32 = arith.constant 0 : i32
    %c0_i32_0 = arith.constant 0 : i32
    return %arg0, %c0_i32 : i32, i32
  }
  func.func @transform_2(%arg0: i32) -> (i32, i32) {
    %c0_i32 = arith.constant 0 : i32
    %c0_i32_0 = arith.constant 0 : i32
    %c0_i32_1 = arith.constant 0 : i32
    return %c0_i32, %c0_i32_0 : i32, i32
  }
  func.func @transform_3(%arg0: i32) -> (i32, i32) {
    %c0_i32 = arith.constant 0 : i32
    %c0_i32_0 = arith.constant 0 : i32
    return %arg0, %c0_i32 : i32, i32
  }
}

</mosaic_0001>

<bundles_post_ra>
// kernel: tpu_custom_call.1
= control target key start
LH: loop header
LB: loop body
LE: loop exit
PB: predicated region body
PF: predicated region fallthrough
CT: control target
= control target key end

     0   :  { %8 = vsyncpa [#allocation3], 0  ;;  %s678_s0 = inlined_call_operand.vmem [shape: f32[8,128], index: 0, kind: input, shape index: {}]   ;;  %s679_s1 = inlined_call_operand.vmem [shape: f32[8,1], index: 1, kind: input, shape index: {}]   ;;  %s680_s2 = inlined_call_operand.hbm [shape: f32[128,512], index: 2, kind: input, shape index: {}]   ;;  %s681_s3 = inlined_call_operand.hbm [shape: f32[8,128], index: 3, kind: output, shape index: {}]  }
   0x1   :  { %9 = vsyncpa [#allocation4], 0  ;;  %s537_s12 = smov [#allocation2]   ;;  %s489_s16 = scalar_lea.hbm %s680_s2, 8192 }
   0x2   :  { %s19_s13 = sshll.u32 %s537_s12, 4  ;;  %p490_p0 = scmp.ne.s32.totalorder %s680_s2, %s489_s16  ;;  %s20_s13 = int_to_ptr.vmem [resolvable:$true] %s19_s13 }
   0x3   :  { %p493_p1 = scmp.lt.u32.totalorder %s489_s16, %s680_s2 }
   0x5   :  { %p495_p2 = pnand %p493_p1, %p490_p0 }
   0x7   :  { %498 = shalt.err (!%p495_p2)
}
   0x8   :  { %s499_s21 = scalar_lea.vmem %s20_s13, 8192  ;;  %p504_p4 = scmp.lt.s32.totalorder %s20_s13, %s20_s13 }
   0x9   :  { %p500_p3 = scmp.ne.s32.totalorder %s20_s13, %s499_s21  ;;  %p505_p5 = scmp.lt.s32.totalorder %s499_s21, %s499_s21 }
   0xb   :  { %p506_p6 = por %p505_p5, %p504_p4 }
   0xd   :  { %p507_p7 = pnand %p506_p6, %p500_p3 }
   0xf   :  { %510 = shalt.err (!%p507_p7)
}
  0x10   :  { %s538_s22 = smov 512   ;;  %s539_s23 = smov 32  }
  0x11   :  { %25 = dma.hbm_to_vmem [thread:$0]  %s680_s2, 8192, %s20_s13, [#allocation3], %s538_s22, %s538_s22, %s539_s23  }
  0x12   :  { %533 = dma.done.wait [#allocation3], 8192  }
  0x13   :  { %534 = vsyncadd [#allocation3], 4294959104  ;;  %v540_v0 = vmov 0.0   ;;  %v541_v1 = vmov 0   ;;  %v31_v2 = vld [vmem:[#allocation2 + $0x8] sm:$0xff]  ;;  %v33_v4 = vld [vmem:[#allocation2 + $0x18] sm:$0xff] }
  0x14   :  { %158 = vmatprep.mubr.f32.mxu0 %v540_v0  ;;  %229 = vmatprep.mubr.f32.mxu1 %v540_v0  ;;  %v35_v3 = vld [vmem:[#allocation2 + $0x28] sm:$0xff]  ;;  %v37_v6 = vld [vmem:[#allocation2 + $0x38] sm:$0xff]  ;;  %v30_v7 = vld [vmem:[#allocation2] sm:$0xff] }
  0x15   :  { %479 = vset.pattern.permute.xlu0 %v541_v1  ;;  %480 = vset.pattern.permute.xlu1 %v541_v1  ;;  %v402_v5 = vpack.c.bf16 %v35_v3, %v31_v2  ;;  %v34_v8 = vld [vmem:[#allocation2 + $0x20] sm:$0xff]  ;;  %v434_v9 = vpack.c.bf16 %v37_v6, %v33_v4  ;;  %v32_v11 = vld [vmem:[#allocation2 + $0x10] sm:$0xff]  ;;  %v39_v13 = vld [vmem:[#allocation2 + $0x48] sm:$0xff] }
  0x16   :  { %v404_v10 = vpack.c.bf16 %v34_v8, %v30_v7  ;;  %v36_v12 = vld [vmem:[#allocation2 + $0x30] sm:$0xff]  ;;  %v43_v15 = vld [vmem:[#allocation2 + $0x68] sm:$0xff]  ;;  %v41_v16 = vld [vmem:[#allocation2 + $0x58] sm:$0xff] }
  0x17   :  { %403 = vmatprep.subr.bf16.mxu0 %v402_v5  ;;  %v436_v14 = vpack.c.bf16 %v36_v12, %v32_v11  ;;  %v45_v17 = vld [vmem:[#allocation2 + $0x78] sm:$0xff]  ;;  %435 = vmatprep.subr.bf16.mxu1 %v434_v9  ;;  %v406_v18 = vpack.c.bf16 %v43_v15, %v39_v13  ;;  %v38_v20 = vld [vmem:[#allocation2 + $0x40] sm:$0xff]  ;;  %v40_v22 = vld [vmem:[#allocation2 + $0x50] sm:$0xff] }
  0x18   :  { %405 = vmatpush1.bf16.msra.mxu0 %v404_v10  ;;  %v438_v19 = vpack.c.bf16 %v45_v17, %v41_v16  ;;  %v42_v21 = vld [vmem:[#allocation2 + $0x60] sm:$0xff]  ;;  %v44_v24 = vld [vmem:[#allocation2 + $0x70] sm:$0xff]  ;;  %v47_v25 = vld [vmem:[#allocation2 + $0x88] sm:$0xff] }
  0x19   :  { %437 = vmatpush1.bf16.msra.mxu1 %v436_v14  ;;  %v408_v23 = vpack.c.bf16 %v42_v21, %v38_v20  ;;  %v51_v26 = vld [vmem:[#allocation2 + $0xa8] sm:$0xff]  ;;  %407 = vmatprep.subr.bf16.mxu0 %v406_v18  ;;  %v440_v27 = vpack.c.bf16 %v44_v24, %v40_v22  ;;  %v49_v29 = vld [vmem:[#allocation2 + $0x98] sm:$0xff]  ;;  %v46_v31 = vld [vmem:[#allocation2 + $0x80] sm:$0xff] }
  0x1a   :  { %439 = vmatprep.subr.bf16.mxu1 %v438_v19  ;;  %v410_v28 = vpack.c.bf16 %v51_v26, %v47_v25  ;;  %v53_v30 = vld [vmem:[#allocation2 + $0xb8] sm:$0xff]  ;;  %v50_v33 = vld [vmem:[#allocation2 + $0xa0] sm:$0xff]  ;;  %v48_v34 = vld [vmem:[#allocation2 + $0x90] sm:$0xff] }
  0x1b   :  { %v442_v32 = vpack.c.bf16 %v53_v30, %v49_v29  ;;  %v52_v35 = vld [vmem:[#allocation2 + $0xb0] sm:$0xff]  ;;  %v412_v36 = vpack.c.bf16 %v50_v33, %v46_v31  ;;  %v55_v37 = vld [vmem:[#allocation2 + $0xc8] sm:$0xff]  ;;  %v57_v39 = vld [vmem:[#allocation2 + $0xd8] sm:$0xff] }
  0x1c   :  { %409 = vmatpush1.bf16.msra.mxu0 %v408_v23  ;;  %v59_v38 = vld [vmem:[#allocation2 + $0xe8] sm:$0xff]  ;;  %v444_v40 = vpack.c.bf16 %v52_v35, %v48_v34  ;;  %v61_v42 = vld [vmem:[#allocation2 + $0xf8] sm:$0xff]  ;;  %v54_v43 = vld [vmem:[#allocation2 + $0xc0] sm:$0xff] }
  0x1d   :  { %441 = vmatpush1.bf16.msra.mxu1 %v440_v27  ;;  %411 = vmatprep.subr.bf16.mxu0 %v410_v28  ;;  %v414_v41 = vpack.c.bf16 %v59_v38, %v55_v37  ;;  %v58_v44 = vld [vmem:[#allocation2 + $0xe0] sm:$0xff]  ;;  %v446_v45 = vpack.c.bf16 %v61_v42, %v57_v39  ;;  %v56_v46 = vld [vmem:[#allocation2 + $0xd0] sm:$0xff]  ;;  %v63_v48 = vld [vmem:[#allocation2 + $0x108] sm:$0xff] }
  0x1e   :  { %443 = vmatprep.subr.bf16.mxu1 %v442_v32  ;;  %v60_v47 = vld [vmem:[#allocation2 + $0xf0] sm:$0xff]  ;;  %v67_v49 = vld [vmem:[#allocation2 + $0x128] sm:$0xff]  ;;  %v65_v50 = vld [vmem:[#allocation2 + $0x118] sm:$0xff]  ;;  %v416_v52 = vpack.c.bf16 %v58_v44, %v54_v43 }
  0x1f   :  { %v69_v51 = vld [vmem:[#allocation2 + $0x138] sm:$0xff]  ;;  %v448_v53 = vpack.c.bf16 %v60_v47, %v56_v46  ;;  %v418_v54 = vpack.c.bf16 %v67_v49, %v63_v48  ;;  %v62_v55 = vld [vmem:[#allocation2 + $0x100] sm:$0xff]  ;;  %v64_v57 = vld [vmem:[#allocation2 + $0x110] sm:$0xff] }
  0x20   :  { %413 = vmatpush1.bf16.msra.mxu0 %v412_v36  ;;  %v66_v56 = vld [vmem:[#allocation2 + $0x120] sm:$0xff]  ;;  %v450_v58 = vpack.c.bf16 %v69_v51, %v65_v50  ;;  %v68_v59 = vld [vmem:[#allocation2 + $0x130] sm:$0xff]  ;;  %v71_v60 = vld [vmem:[#allocation2 + $0x148] sm:$0xff] }
  0x21   :  { %445 = vmatpush1.bf16.msra.mxu1 %v444_v40  ;;  %415 = vmatprep.subr.bf16.mxu0 %v414_v41  ;;  %v75_v61 = vld [vmem:[#allocation2 + $0x168] sm:$0xff]  ;;  %v73_v62 = vld [vmem:[#allocation2 + $0x158] sm:$0xff]  ;;  %v420_v1 = vpack.c.bf16 %v66_v56, %v62_v55  ;;  %v452_v2 = vpack.c.bf16 %v68_v59, %v64_v57  ;;  %v70_v4 = vld [vmem:[#allocation2 + $0x140] sm:$0xff] }
  0x22   :  { %447 = vmatprep.subr.bf16.mxu1 %v446_v45  ;;  %v77_v63 = vld [vmem:[#allocation2 + $0x178] sm:$0xff]  ;;  %v422_v3 = vpack.c.bf16 %v75_v61, %v71_v60  ;;  %v74_v5 = vld [vmem:[#allocation2 + $0x160] sm:$0xff]  ;;  %v72_v6 = vld [vmem:[#allocation2 + $0x150] sm:$0xff] }
  0x23   :  { %v454_v7 = vpack.c.bf16 %v77_v63, %v73_v62  ;;  %v76_v8 = vld [vmem:[#allocation2 + $0x170] sm:$0xff]  ;;  %v79_v9 = vld [vmem:[#allocation2 + $0x188] sm:$0xff]  ;;  %v81_v11 = vld [vmem:[#allocation2 + $0x198] sm:$0xff]  ;;  %v424_v13 = vpack.c.bf16 %v74_v5, %v70_v4 }
  0x24   :  { %417 = vmatpush1.bf16.msra.mxu0 %v416_v52  ;;  %v83_v10 = vld [vmem:[#allocation2 + $0x1a8] sm:$0xff]  ;;  %v85_v12 = vld [vmem:[#allocation2 + $0x1b8] sm:$0xff]  ;;  %v78_v14 = vld [vmem:[#allocation2 + $0x180] sm:$0xff]  ;;  %v456_v15 = vpack.c.bf16 %v76_v8, %v72_v6 }
  0x25   :  { %449 = vmatpush1.bf16.msra.mxu1 %v448_v53  ;;  %419 = vmatprep.subr.bf16.mxu0 %v418_v54  ;;  %v426_v16 = vpack.c.bf16 %v83_v10, %v79_v9  ;;  %v82_v17 = vld [vmem:[#allocation2 + $0x1a0] sm:$0xff]  ;;  %v80_v18 = vld [vmem:[#allocation2 + $0x190] sm:$0xff]  ;;  %v458_v20 = vpack.c.bf16 %v85_v12, %v81_v11  ;;  %v87_v22 = vld [vmem:[#allocation2 + $0x1c8] sm:$0xff]  ;;  %v242_v54 = vlaneseq }
  0x26   :  { %451 = vmatprep.subr.bf16.mxu1 %v450_v58  ;;  %v245_v19 = vld [vmem:[%s679_s1] sm:$0xff]  ;;  %v84_v21 = vld [vmem:[#allocation2 + $0x1b0] sm:$0xff]  ;;  %v91_v23 = vld [vmem:[#allocation2 + $0x1e8] sm:$0xff]  ;;  %v428_v27 = vpack.c.bf16 %v82_v17, %v78_v14 }
  0x27   :  { %v580_v24 = vmul.f32 0.5, %v245_v19  ;;  %v89_v25 = vld [vmem:[#allocation2 + $0x1d8] sm:$0xff]  ;;  %v460_v28 = vpack.c.bf16 %v84_v21, %v80_v18  ;;  %v430_v29 = vpack.c.bf16 %v91_v23, %v87_v22  ;;  %v86_v30 = vld [vmem:[#allocation2 + $0x1c0] sm:$0xff]  ;;  %v88_v33 = vld [vmem:[#allocation2 + $0x1d0] sm:$0xff]  ;;  %v598_v56 = vand.u32 127, %v242_v54 }
  0x28   :  { %421 = vmatpush1.bf16.msra.mxu0 %v420_v1  ;;  %v93_v26 = vld [vmem:[#allocation2 + $0x1f8] sm:$0xff]  ;;  %v90_v31 = vld [vmem:[#allocation2 + $0x1e0] sm:$0xff]  ;;  %v92_v34 = vld [vmem:[#allocation2 + $0x1f0] sm:$0xff] }
  0x29   :  { %453 = vmatpush1.bf16.msra.mxu1 %v452_v2  ;;  %423 = vmatprep.subr.bf16.mxu0 %v422_v3  ;;  %481 = vrcp.f32 %v580_v24  ;;  %v462_v32 = vpack.c.bf16 %v93_v26, %v89_v25  ;;  %v432_v35 = vpack.c.bf16 %v90_v31, %v86_v30  ;;  %v464_v36 = vpack.c.bf16 %v92_v34, %v88_v33  ;;  %v29_v37 = vld [vmem:[%s678_s0] sm:$0xff]  ;;  %s542_s0 = smov [#allocation5]  }
  0x2a   :  { %455 = vmatprep.subr.bf16.mxu1 %v454_v7  ;;  %v601_v57 = vadd.s32 128, %v598_v56  ;;  %s387_s28 = sshll.u32 %s542_s0, 4  ;;  %s388_s28 = int_to_ptr.vmem [resolvable:$true] %s387_s28 }
  0x2b   :  { %s511_s29 = scalar_lea.vmem %s388_s28, 128  ;;  %p516_p9 = scmp.lt.s32.totalorder %s388_s28, %s388_s28 }
  0x2c   :  { %425 = vmatpush1.bf16.msra.mxu0 %v424_v13  ;;  %p512_p8 = scmp.ne.s32.totalorder %s388_s28, %s511_s29  ;;  %p517_p10 = scmp.lt.s32.totalorder %s511_s29, %s511_s29 }
  0x2d   :  { %457 = vmatpush1.bf16.msra.mxu1 %v456_v15  ;;  %427 = vmatprep.subr.bf16.mxu0 %v426_v16 }
  0x2e   :  { %459 = vmatprep.subr.bf16.mxu1 %v458_v20  ;;  %v311_v20 = vmul.f32 0.007751938, %v580_v24  ;;  %p518_p11 = por %p517_p10, %p516_p9 }
  0x30   :  { %429 = vmatpush1.bf16.msra.mxu0 %v428_v27  ;;  %483 = vrcp.f32 %v311_v20  ;;  %p519_p12 = pnand %p518_p11, %p512_p8 }
  0x31   :  { %461 = vmatpush1.bf16.msra.mxu1 %v460_v28  ;;  %431 = vmatprep.subr.bf16.mxu0 %v430_v29 }
  0x32   :  { %463 = vmatprep.subr.bf16.mxu1 %v462_v32 }
  0x33   :  { %v482_v38 = vpop.eup %481 }
  0x34   :  { %433 = vmatpush1.bf16.msra.mxu0 %v432_v35  ;;  %v248_v39 = vmul.f32 128.0, %v482_v38 }
  0x35   :  { %465 = vmatpush1.bf16.msra.mxu1 %v464_v36 }
  0x36   :  { %v249_v40 = vmul.f32 0.6666667, %v248_v39  ;;  %v255_v41 = vmul.f32 3.0, %v248_v39 }
  0x37   :  { %159 = vmatmul.mubr.f32.vlgmr.msra.gmra.mrb[0].mxu0 %v29_v37 }
  0x38   :  { %230 = vmatmul.mubr.f32.vlgmr.msra.gmra.mrb[0].mxu1 %v29_v37  ;;  %v396_v42 = vadd.f32 -0.5, %v249_v40  ;;  %v397_v43 = vadd.f32 -0.5, %v255_v41 }
  0x3a   :  { %v251_v44 = vceil.f32 %v396_v42  ;;  %v257_v45 = vceil.f32 %v397_v43  ;;  %v484_v21 = vpop.eup %483 }
  0x3b   :  { %v313_v22 = vmul.f32 0.1, %v484_v21 }
  0x3c   :  { %v252_v46 = vmax.f32 %v251_v44, 0.0  ;;  %v258_v47 = vmax.f32 %v257_v45, 0.0 }
  0x3d   :  { %v470_v23 = vround.rtne.f32 %v313_v22 }
  0x3e   :  { %v253_v48 = vmin.f32 %v252_v46, 128.0  ;;  %v259_v49 = vmin.f32 %v258_v47, 128.0 }
  0x3f   :  { %v315_v25 = vmax.f32 %v470_v23, 1.0 }
  0x40   :  { %v586_v50 = vtrunc.f32 %v253_v48  ;;  %v588_v51 = vtrunc.f32 %v259_v49 }
  0x41   :  { %v471_v27 = vtrunc.f32 %v315_v25 }
  0x42   :  { %v467_v52 = vcvt.f32.s32 %v586_v50  ;;  %v469_v53 = vcvt.f32.s32 %v588_v51 }
  0x43   :  { %v472_v30 = vcvt.f32.s32 %v471_v27 }
  0x44   :  { %262 = vperm.xlu0 %479, %v467_v52   ;;  %v351_v48 = vsub.s32 %v469_v53, %v467_v52 }
  0x46   :  { %v352_v49 = vcvt.s32.f32 %v351_v48 }
  0x48   :  { %267 = vperm.xlu0 %479, %v469_v53   ;;  %v353_v54 = vmul.f32 1e-08, %v352_v49 }
  0xc3   :  { %v596_v55 = vpop.permute.xlu0 %262 }
  0xc4   :  { %vm264_vm0 = vcmp.ge.s32.totalorder %v598_v56, %v596_v55  ;;  %vm265_vm2 = vcmp.ge.s32.totalorder %v601_v57, %v596_v55 }
  0xc7   :  { %v603_v58 = vpop.permute.xlu0 %267 }
  0xc8   :  { %vm269_vm1 = vcmp.lt.s32.totalorder %v598_v56, %v603_v58  ;;  %vm270_vm3 = vcmp.lt.s32.totalorder %v601_v57, %v603_v58 }
  0xc9   :  { %vm271_vm4 = vmand %vm264_vm0, %vm269_vm1 }
  0xca   :  { %vm272_vm5 = vmand %vm265_vm2, %vm270_vm3 }
 0x10a   :  { %v160_v59 = vpop.f32.mrb[0].mxu0 }
 0x10b   :  { %v236_v60 = vmul.f32 %v160_v59, %v160_v59  ;;  %v231_v61 = vpop.f32.mrb[0].mxu1  ;;  %v162_v62 = vpop.f32.mrb[1].mxu0 }
 0x10c   :  { %v238_v63 = vmul.f32 %v231_v61, %v231_v61  ;;  %v237_v1 = vmul.f32 %v162_v62, %v162_v62  ;;  %v233_v2 = vpop.f32.mrb[1].mxu1 }
 0x10d   :  { %v239_v3 = vmul.f32 %v233_v2, %v233_v2 }
 0x10e   :  { %v613_v4 = vadd.f32 %v238_v63, %v236_v60 }
 0x10f   :  { %v615_v5 = vadd.f32 %v239_v3, %v237_v1 }
 0x110   :  { %v276_v6 = vsel %vm271_vm4, %v613_v4, 0.0 }
 0x111   :  { %v277_v7 = vsel %vm272_vm5, %v615_v5, 0.0  ;;  %v273_v47 = vadd.f32 %v615_v5, %v613_v4 }
 0x112   :  { %v285_v8 = vmax.f32 %v276_v6, %v277_v7  ;;  %v278_v9 = vadd.f32 %v277_v7, %v276_v6 }
 0x114   :  { %286 = vmax.xlane.f32.xlu1 %v285_v8 }
 0x1a1   :  { %v287_v10 = vpop.xlane.xlu1 %286 }
 0x1a2   :  { %vm288_vm6 = vcmp.eq.f32.partialorder %v613_v4, %v287_v10  ;;  %vm289_vm7 = vcmp.eq.f32.partialorder %v615_v5, %v287_v10 }
 0x1a3   :  { %vm290_vm8 = vmand %vm271_vm4, %vm288_vm6 }
 0x1a4   :  { %vm291_vm9 = vmand %vm272_vm5, %vm289_vm7  ;;  %v292_v11 = vsel %vm290_vm8, %v598_v56, 256 }
 0x1a5   :  { %v293_v12 = vsel %vm291_vm9, %v601_v57, 256 }
 0x1a6   :  { %vm294_vm10 = vcmp.lt.s32.totalorder %v292_v11, %v293_v12 }
 0x1a7   :  { %v295_v13 = vsel %vm294_vm10, %v292_v11, %v293_v12 }
 0x1a8   :  { %v297_v14 = vshra.s32 %v295_v13, 16  ;;  %v296_v16 = vand.u32 65535, %v295_v13 }
 0x1aa   :  { %v299_v15 = vcvt.s32.f32 %v297_v14  ;;  %v298_v18 = vcvt.s32.f32 %v296_v16 }
 0x1ac   :  { %300 = vmin.xlane.f32.xlu1 %v299_v15 }
 0x239   :  { %v301_v17 = vpop.xlane.xlu1 %300 }
 0x23a   :  { %vm302_vm11 = vcmp.eq.f32.partialorder %v299_v15, %v301_v17  ;;  %v307_v26 = vcvt.f32.s32 %v301_v17 }
 0x23b   :  { %v303_v19 = vsel %vm302_vm11, %v298_v18, inf }
 0x23c   :  { %304 = vmin.xlane.f32.xlu0 %v303_v19  ;;  %v308_v29 = vshll.u32 %v307_v26, 16 }
 0x2c9   :  { %v305_v28 = vpop.xlane.xlu0 %304 }
 0x2ca   :  { %v306_v31 = vcvt.f32.s32 %v305_v28 }
 0x2cc   :  { %v309_v32 = vadd.s32 %v308_v29, %v306_v31 }
 0x2ce   :  { %v317_v33 = vsub.s32 %v309_v32, %v472_v30  ;;  %v321_v36 = vadd.s32 %v472_v30, %v309_v32 }
 0x2d0   :  { %vm318_vm12 = vcmp.lt.s32.totalorder %v317_v33, 0  ;;  %v319_v34 = vadd.s32 129, %v317_v33 }
 0x2d2   :  { %v320_v35 = vsel %vm318_vm12, %v319_v34, %v317_v33 }
 0x2d3   :  { %323 = vperm.xlu1 %480, %v320_v35  }
 0x2d7   :  { %334 = vperm.xlu1 %480, %v321_v36  }
 0x2fb   :  { %279 = vadd.xlane.f32.xlu1 %v278_v9 }
 0x352   :  { %v324_v24 = vpop.permute.xlu1 %323 }
 0x353   :  { %vm325_vm13 = vcmp.lt.s32.totalorder %v598_v56, %v324_v24  ;;  %vm326_vm14 = vcmp.lt.s32.totalorder %v601_v57, %v324_v24 }
 0x354   :  { %vm327_vm15 = vmand %vm264_vm0, %vm325_vm13  ;;  %vm363_vm0 = vcmask 7168  }
 0x355   :  { %vm328_vm4 = vmand %vm265_vm2, %vm326_vm14  ;;  %v398_v38 = vsel %vm327_vm15, 1.0, %v540_v0  ;;  %vm371_vm2 = vcmp.eq.s32.totalorder %v598_v56, 0 }
 0x356   :  { %v335_v37 = vpop.permute.xlu1 %334  ;;  %v399_v40 = vsel %vm328_vm4, 1.0, %v540_v0 }
 0x357   :  { %vm336_vm5 = vcmp.ge.s32.totalorder %v598_v56, %v335_v37  ;;  %vm337_vm6 = vcmp.ge.s32.totalorder %v601_v57, %v335_v37 }
 0x358   :  { %vm338_vm7 = vmand %vm336_vm5, %vm269_vm1  ;;  %vm372_vm1 = vcmp.eq.s32.totalorder %v598_v56, 1 }
 0x359   :  { %vm339_vm8 = vmand %vm337_vm6, %vm270_vm3  ;;  %v400_v39 = vsel %vm338_vm7, 1.0, %v540_v0 }
 0x35a   :  { %v401_v41 = vsel %vm339_vm8, 1.0, %v540_v0  ;;  %v344_v42 = vadd.f32 %v400_v39, %v398_v38 }
 0x35b   :  { %v345_v43 = vadd.f32 %v401_v41, %v399_v40 }
 0x35c   :  { %v346_v44 = vmul.f32 %v344_v42, %v613_v4 }
 0x35d   :  { %v347_v45 = vmul.f32 %v345_v43, %v615_v5 }
 0x35f   :  { %v348_v46 = vadd.f32 %v347_v45, %v346_v44 }
 0x361   :  { %349 = vadd.xlane.f32.xlu0 %v348_v46 }
 0x365   :  { %274 = vadd.xlane.f32.xlu0 %v273_v47 }
 0x388   :  { %v280_v0 = vpop.xlane.xlu1 %279 }
 0x389   :  { %v354_v55 = vadd.f32 %v353_v54, %v280_v0 }
 0x38b   :  { %485 = vrcp.f32 %v354_v55 }
 0x395   :  { %v486_v57 = vpop.eup %485 }
 0x3ee   :  { %v350_v58 = vpop.xlane.xlu0 %349 }
 0x3ef   :  { %v356_v59 = vmul.f32 %v486_v57, %v350_v58 }
 0x3f1   :  { %v364_v60 = vsel %vm363_vm0, %v356_v59, 0.0 }
 0x3f2   :  { %v365_v61 = vrot.slane %v364_v60, 4  ;;  %v275_v50 = vpop.xlane.xlu0 %274 }
 0x3f3   :  { %v282_v51 = vadd.f32 1e-08, %v275_v50  ;;  %v281_v53 = vsub.f32 %v275_v50, %v280_v0 }
 0x3f4   :  { %v366_v62 = vadd.f32 %v365_v61, %v364_v60 }
 0x3f5   :  { %487 = vrcp.f32 %v282_v51 }
 0x3f6   :  { %v367_v63 = vrot.slane %v366_v62, 2 }
 0x3f8   :  { %v368_v1 = vadd.f32 %v367_v63, %v366_v62 }
 0x3fa   :  { %v369_v2 = vrot.slane %v368_v1, 1 }
 0x3fc   :  { %v370_v3 = vadd.f32 %v369_v2, %v368_v1 }
 0x3fe   :  { %375 = vperm.xlu0 %479, %v370_v3  }
 0x3ff   :  { %v488_v52 = vpop.eup %487 }
 0x400   :  { %v284_v4 = vmul.f32 %v488_v52, %v281_v53 }
 0x402   :  { %v357_v5 = vrot.slane %v284_v4, 4 }
 0x404   :  { %v358_v6 = vadd.f32 %v357_v5, %v284_v4 }
 0x406   :  { %v359_v7 = vrot.slane %v358_v6, 2 }
 0x408   :  { %v360_v8 = vadd.f32 %v359_v7, %v358_v6 }
 0x40a   :  { %v361_v9 = vrot.slane %v360_v8, 1 }
 0x40c   :  { %v362_v11 = vadd.f32 %v361_v9, %v360_v8 }
 0x47d   :  { %v376_v10 = vpop.permute.xlu0 %375 }
 0x47e   :  { %v378_v12 = vsel %vm372_vm1, %v376_v10, 0.0 }
 0x47f   :  { %v379_v13 = vsel %vm371_vm2, %v362_v11, %v378_v12 }
 0x480   :  { %380 = vst [vmem:[#allocation5] sm:$0xff] %v379_v13 }
 0x481   :  { %522 = shalt.err (!%p519_p12)
}
 0x482   :  { %s523_s5 = scalar_lea.hbm %s681_s3, 128 }
 0x483   :  { %p524_p13 = scmp.ne.s32.totalorder %s681_s3, %s523_s5  ;;  %p527_p0 = scmp.lt.u32.totalorder %s523_s5, %s681_s3 }
 0x485   :  { %p529_p1 = pnand %p527_p0, %p524_p13 }
 0x487   :  { %532 = shalt.err (!%p529_p1)
}
 0x488   :  { %390 = dma.vmem_to_hbm [thread:$0]  %s388_s28, 128, %s681_s3, [#allocation4]  }
 0x489   :  { %535 = dma.done.wait [#allocation4], 128  }
 0x48a   :  { %536 = vsyncadd [#allocation4], 4294967168 }
 0x48b   :  { %394 = vsyncpa [#allocation3], 1 }
 0x48c   :  { %395 = vsyncpa [#allocation4], 1 }

// kernel: tpu_custom_call.1
= control target key start
LH: loop header
LB: loop body
LE: loop exit
PB: predicated region body
PF: predicated region fallthrough
CT: control target
= control target key end

     0   :  { %8 = vsyncpa [#allocation3], 0  ;;  %s678_s0 = inlined_call_operand.vmem [shape: f32[8,128], index: 0, kind: input, shape index: {}]   ;;  %s679_s1 = inlined_call_operand.vmem [shape: f32[8,1], index: 1, kind: input, shape index: {}]   ;;  %s680_s2 = inlined_call_operand.hbm [shape: f32[128,512], index: 2, kind: input, shape index: {}]   ;;  %s681_s3 = inlined_call_operand.hbm [shape: f32[8,128], index: 3, kind: output, shape index: {}]  }
   0x1   :  { %9 = vsyncpa [#allocation4], 0  ;;  %s537_s12 = smov [#allocation2]   ;;  %s489_s16 = scalar_lea.hbm %s680_s2, 8192 }
   0x2   :  { %s19_s13 = sshll.u32 %s537_s12, 4  ;;  %p490_p0 = scmp.ne.s32.totalorder %s680_s2, %s489_s16  ;;  %s20_s13 = int_to_ptr.vmem [resolvable:$true] %s19_s13 }
   0x3   :  { %p493_p1 = scmp.lt.u32.totalorder %s489_s16, %s680_s2 }
   0x5   :  { %p495_p2 = pnand %p493_p1, %p490_p0 }
   0x7   :  { %498 = shalt.err (!%p495_p2)
}
   0x8   :  { %s499_s21 = scalar_lea.vmem %s20_s13, 8192  ;;  %p504_p4 = scmp.lt.s32.totalorder %s20_s13, %s20_s13 }
   0x9   :  { %p500_p3 = scmp.ne.s32.totalorder %s20_s13, %s499_s21  ;;  %p505_p5 = scmp.lt.s32.totalorder %s499_s21, %s499_s21 }
   0xb   :  { %p506_p6 = por %p505_p5, %p504_p4 }
   0xd   :  { %p507_p7 = pnand %p506_p6, %p500_p3 }
   0xf   :  { %510 = shalt.err (!%p507_p7)
}
  0x10   :  { %s538_s22 = smov 512   ;;  %s539_s23 = smov 32  }
  0x11   :  { %25 = dma.hbm_to_vmem [thread:$0]  %s680_s2, 8192, %s20_s13, [#allocation3], %s538_s22, %s538_s22, %s539_s23  }
  0x12   :  { %533 = dma.done.wait [#allocation3], 8192  }
  0x13   :  { %534 = vsyncadd [#allocation3], 4294959104  ;;  %v540_v0 = vmov 0.0   ;;  %v541_v1 = vmov 0   ;;  %v31_v2 = vld [vmem:[#allocation2 + $0x8] sm:$0xff]  ;;  %v33_v4 = vld [vmem:[#allocation2 + $0x18] sm:$0xff] }
  0x14   :  { %158 = vmatprep.mubr.f32.mxu0 %v540_v0  ;;  %229 = vmatprep.mubr.f32.mxu1 %v540_v0  ;;  %v35_v3 = vld [vmem:[#allocation2 + $0x28] sm:$0xff]  ;;  %v37_v6 = vld [vmem:[#allocation2 + $0x38] sm:$0xff]  ;;  %v30_v7 = vld [vmem:[#allocation2] sm:$0xff] }
  0x15   :  { %479 = vset.pattern.permute.xlu0 %v541_v1  ;;  %480 = vset.pattern.permute.xlu1 %v541_v1  ;;  %v402_v5 = vpack.c.bf16 %v35_v3, %v31_v2  ;;  %v34_v8 = vld [vmem:[#allocation2 + $0x20] sm:$0xff]  ;;  %v434_v9 = vpack.c.bf16 %v37_v6, %v33_v4  ;;  %v32_v11 = vld [vmem:[#allocation2 + $0x10] sm:$0xff]  ;;  %v39_v13 = vld [vmem:[#allocation2 + $0x48] sm:$0xff] }
  0x16   :  { %v404_v10 = vpack.c.bf16 %v34_v8, %v30_v7  ;;  %v36_v12 = vld [vmem:[#allocation2 + $0x30] sm:$0xff]  ;;  %v43_v15 = vld [vmem:[#allocation2 + $0x68] sm:$0xff]  ;;  %v41_v16 = vld [vmem:[#allocation2 + $0x58] sm:$0xff] }
  0x17   :  { %403 = vmatprep.subr.bf16.mxu0 %v402_v5  ;;  %v436_v14 = vpack.c.bf16 %v36_v12, %v32_v11  ;;  %v45_v17 = vld [vmem:[#allocation2 + $0x78] sm:$0xff]  ;;  %435 = vmatprep.subr.bf16.mxu1 %v434_v9  ;;  %v406_v18 = vpack.c.bf16 %v43_v15, %v39_v13  ;;  %v38_v20 = vld [vmem:[#allocation2 + $0x40] sm:$0xff]  ;;  %v40_v22 = vld [vmem:[#allocation2 + $0x50] sm:$0xff] }
  0x18   :  { %405 = vmatpush1.bf16.msra.mxu0 %v404_v10  ;;  %v438_v19 = vpack.c.bf16 %v45_v17, %v41_v16  ;;  %v42_v21 = vld [vmem:[#allocation2 + $0x60] sm:$0xff]  ;;  %v44_v24 = vld [vmem:[#allocation2 + $0x70] sm:$0xff]  ;;  %v47_v25 = vld [vmem:[#allocation2 + $0x88] sm:$0xff] }
  0x19   :  { %437 = vmatpush1.bf16.msra.mxu1 %v436_v14  ;;  %v408_v23 = vpack.c.bf16 %v42_v21, %v38_v20  ;;  %v51_v26 = vld [vmem:[#allocation2 + $0xa8] sm:$0xff]  ;;  %407 = vmatprep.subr.bf16.mxu0 %v406_v18  ;;  %v440_v27 = vpack.c.bf16 %v44_v24, %v40_v22  ;;  %v49_v29 = vld [vmem:[#allocation2 + $0x98] sm:$0xff]  ;;  %v46_v31 = vld [vmem:[#allocation2 + $0x80] sm:$0xff] }
  0x1a   :  { %439 = vmatprep.subr.bf16.mxu1 %v438_v19  ;;  %v410_v28 = vpack.c.bf16 %v51_v26, %v47_v25  ;;  %v53_v30 = vld [vmem:[#allocation2 + $0xb8] sm:$0xff]  ;;  %v50_v33 = vld [vmem:[#allocation2 + $0xa0] sm:$0xff]  ;;  %v48_v34 = vld [vmem:[#allocation2 + $0x90] sm:$0xff] }
  0x1b   :  { %v442_v32 = vpack.c.bf16 %v53_v30, %v49_v29  ;;  %v52_v35 = vld [vmem:[#allocation2 + $0xb0] sm:$0xff]  ;;  %v412_v36 = vpack.c.bf16 %v50_v33, %v46_v31  ;;  %v55_v37 = vld [vmem:[#allocation2 + $0xc8] sm:$0xff]  ;;  %v57_v39 = vld [vmem:[#allocation2 + $0xd8] sm:$0xff] }
  0x1c   :  { %409 = vmatpush1.bf16.msra.mxu0 %v408_v23  ;;  %v59_v38 = vld [vmem:[#allocation2 + $0xe8] sm:$0xff]  ;;  %v444_v40 = vpack.c.bf16 %v52_v35, %v48_v34  ;;  %v61_v42 = vld [vmem:[#allocation2 + $0xf8] sm:$0xff]  ;;  %v54_v43 = vld [vmem:[#allocation2 + $0xc0] sm:$0xff] }
  0x1d   :  { %441 = vmatpush1.bf16.msra.mxu1 %v440_v27  ;;  %411 = vmatprep.subr.bf16.mxu0 %v410_v28  ;;  %v414_v41 = vpack.c.bf16 %v59_v38, %v55_v37  ;;  %v58_v44 = vld [vmem:[#allocation2 + $0xe0] sm:$0xff]  ;;  %v446_v45 = vpack.c.bf16 %v61_v42, %v57_v39  ;;  %v56_v46 = vld [vmem:[#allocation2 + $0xd0] sm:$0xff]  ;;  %v63_v48 = vld [vmem:[#allocation2 + $0x108] sm:$0xff] }
  0x1e   :  { %443 = vmatprep.subr.bf16.mxu1 %v442_v32  ;;  %v60_v47 = vld [vmem:[#allocation2 + $0xf0] sm:$0xff]  ;;  %v67_v49 = vld [vmem:[#allocation2 + $0x128] sm:$0xff]  ;;  %v65_v50 = vld [vmem:[#allocation2 + $0x118] sm:$0xff]  ;;  %v416_v52 = vpack.c.bf16 %v58_v44, %v54_v43 }
  0x1f   :  { %v69_v51 = vld [vmem:[#allocation2 + $0x138] sm:$0xff]  ;;  %v448_v53 = vpack.c.bf16 %v60_v47, %v56_v46  ;;  %v418_v54 = vpack.c.bf16 %v67_v49, %v63_v48  ;;  %v62_v55 = vld [vmem:[#allocation2 + $0x100] sm:$0xff]  ;;  %v64_v57 = vld [vmem:[#allocation2 + $0x110] sm:$0xff] }
  0x20   :  { %413 = vmatpush1.bf16.msra.mxu0 %v412_v36  ;;  %v66_v56 = vld [vmem:[#allocation2 + $0x120] sm:$0xff]  ;;  %v450_v58 = vpack.c.bf16 %v69_v51, %v65_v50  ;;  %v68_v59 = vld [vmem:[#allocation2 + $0x130] sm:$0xff]  ;;  %v71_v60 = vld [vmem:[#allocation2 + $0x148] sm:$0xff] }
  0x21   :  { %445 = vmatpush1.bf16.msra.mxu1 %v444_v40  ;;  %415 = vmatprep.subr.bf16.mxu0 %v414_v41  ;;  %v75_v61 = vld [vmem:[#allocation2 + $0x168] sm:$0xff]  ;;  %v73_v62 = vld [vmem:[#allocation2 + $0x158] sm:$0xff]  ;;  %v420_v1 = vpack.c.bf16 %v66_v56, %v62_v55  ;;  %v452_v2 = vpack.c.bf16 %v68_v59, %v64_v57  ;;  %v70_v4 = vld [vmem:[#allocation2 + $0x140] sm:$0xff] }
  0x22   :  { %447 = vmatprep.subr.bf16.mxu1 %v446_v45  ;;  %v77_v63 = vld [vmem:[#allocation2 + $0x178] sm:$0xff]  ;;  %v422_v3 = vpack.c.bf16 %v75_v61, %v71_v60  ;;  %v74_v5 = vld [vmem:[#allocation2 + $0x160] sm:$0xff]  ;;  %v72_v6 = vld [vmem:[#allocation2 + $0x150] sm:$0xff] }
  0x23   :  { %v454_v7 = vpack.c.bf16 %v77_v63, %v73_v62  ;;  %v76_v8 = vld [vmem:[#allocation2 + $0x170] sm:$0xff]  ;;  %v79_v9 = vld [vmem:[#allocation2 + $0x188] sm:$0xff]  ;;  %v81_v11 = vld [vmem:[#allocation2 + $0x198] sm:$0xff]  ;;  %v424_v13 = vpack.c.bf16 %v74_v5, %v70_v4 }
  0x24   :  { %417 = vmatpush1.bf16.msra.mxu0 %v416_v52  ;;  %v83_v10 = vld [vmem:[#allocation2 + $0x1a8] sm:$0xff]  ;;  %v85_v12 = vld [vmem:[#allocation2 + $0x1b8] sm:$0xff]  ;;  %v78_v14 = vld [vmem:[#allocation2 + $0x180] sm:$0xff]  ;;  %v456_v15 = vpack.c.bf16 %v76_v8, %v72_v6 }
  0x25   :  { %449 = vmatpush1.bf16.msra.mxu1 %v448_v53  ;;  %419 = vmatprep.subr.bf16.mxu0 %v418_v54  ;;  %v426_v16 = vpack.c.bf16 %v83_v10, %v79_v9  ;;  %v82_v17 = vld [vmem:[#allocation2 + $0x1a0] sm:$0xff]  ;;  %v80_v18 = vld [vmem:[#allocation2 + $0x190] sm:$0xff]  ;;  %v458_v20 = vpack.c.bf16 %v85_v12, %v81_v11  ;;  %v87_v22 = vld [vmem:[#allocation2 + $0x1c8] sm:$0xff]  ;;  %v242_v54 = vlaneseq }
  0x26   :  { %451 = vmatprep.subr.bf16.mxu1 %v450_v58  ;;  %v245_v19 = vld [vmem:[%s679_s1] sm:$0xff]  ;;  %v84_v21 = vld [vmem:[#allocation2 + $0x1b0] sm:$0xff]  ;;  %v91_v23 = vld [vmem:[#allocation2 + $0x1e8] sm:$0xff]  ;;  %v428_v27 = vpack.c.bf16 %v82_v17, %v78_v14 }
  0x27   :  { %v580_v24 = vmul.f32 0.5, %v245_v19  ;;  %v89_v25 = vld [vmem:[#allocation2 + $0x1d8] sm:$0xff]  ;;  %v460_v28 = vpack.c.bf16 %v84_v21, %v80_v18  ;;  %v430_v29 = vpack.c.bf16 %v91_v23, %v87_v22  ;;  %v86_v30 = vld [vmem:[#allocation2 + $0x1c0] sm:$0xff]  ;;  %v88_v33 = vld [vmem:[#allocation2 + $0x1d0] sm:$0xff]  ;;  %v598_v56 = vand.u32 127, %v242_v54 }
  0x28   :  { %421 = vmatpush1.bf16.msra.mxu0 %v420_v1  ;;  %v93_v26 = vld [vmem:[#allocation2 + $0x1f8] sm:$0xff]  ;;  %v90_v31 = vld [vmem:[#allocation2 + $0x1e0] sm:$0xff]  ;;  %v92_v34 = vld [vmem:[#allocation2 + $0x1f0] sm:$0xff] }
  0x29   :  { %453 = vmatpush1.bf16.msra.mxu1 %v452_v2  ;;  %423 = vmatprep.subr.bf16.mxu0 %v422_v3  ;;  %481 = vrcp.f32 %v580_v24  ;;  %v462_v32 = vpack.c.bf16 %v93_v26, %v89_v25  ;;  %v432_v35 = vpack.c.bf16 %v90_v31, %v86_v30  ;;  %v464_v36 = vpack.c.bf16 %v92_v34, %v88_v33  ;;  %v29_v37 = vld [vmem:[%s678_s0] sm:$0xff]  ;;  %s542_s0 = smov [#allocation5]  }
  0x2a   :  { %455 = vmatprep.subr.bf16.mxu1 %v454_v7  ;;  %v601_v57 = vadd.s32 128, %v598_v56  ;;  %s387_s28 = sshll.u32 %s542_s0, 4  ;;  %s388_s28 = int_to_ptr.vmem [resolvable:$true] %s387_s28 }
  0x2b   :  { %s511_s29 = scalar_lea.vmem %s388_s28, 128  ;;  %p516_p9 = scmp.lt.s32.totalorder %s388_s28, %s388_s28 }
  0x2c   :  { %425 = vmatpush1.bf16.msra.mxu0 %v424_v13  ;;  %p512_p8 = scmp.ne.s32.totalorder %s388_s28, %s511_s29  ;;  %p517_p10 = scmp.lt.s32.totalorder %s511_s29, %s511_s29 }
  0x2d   :  { %457 = vmatpush1.bf16.msra.mxu1 %v456_v15  ;;  %427 = vmatprep.subr.bf16.mxu0 %v426_v16 }
  0x2e   :  { %459 = vmatprep.subr.bf16.mxu1 %v458_v20  ;;  %v311_v20 = vmul.f32 0.007751938, %v580_v24  ;;  %p518_p11 = por %p517_p10, %p516_p9 }
  0x30   :  { %429 = vmatpush1.bf16.msra.mxu0 %v428_v27  ;;  %483 = vrcp.f32 %v311_v20  ;;  %p519_p12 = pnand %p518_p11, %p512_p8 }
  0x31   :  { %461 = vmatpush1.bf16.msra.mxu1 %v460_v28  ;;  %431 = vmatprep.subr.bf16.mxu0 %v430_v29 }
  0x32   :  { %463 = vmatprep.subr.bf16.mxu1 %v462_v32 }
  0x33   :  { %v482_v38 = vpop.eup %481 }
  0x34   :  { %433 = vmatpush1.bf16.msra.mxu0 %v432_v35  ;;  %v248_v39 = vmul.f32 128.0, %v482_v38 }
  0x35   :  { %465 = vmatpush1.bf16.msra.mxu1 %v464_v36 }
  0x36   :  { %v249_v40 = vmul.f32 0.6666667, %v248_v39  ;;  %v255_v41 = vmul.f32 3.0, %v248_v39 }
  0x37   :  { %159 = vmatmul.mubr.f32.vlgmr.msra.gmra.mrb[0].mxu0 %v29_v37 }
  0x38   :  { %230 = vmatmul.mubr.f32.vlgmr.msra.gmra.mrb[0].mxu1 %v29_v37  ;;  %v396_v42 = vadd.f32 -0.5, %v249_v40  ;;  %v397_v43 = vadd.f32 -0.5, %v255_v41 }
  0x3a   :  { %v251_v44 = vceil.f32 %v396_v42  ;;  %v257_v45 = vceil.f32 %v397_v43  ;;  %v484_v21 = vpop.eup %483 }
  0x3b   :  { %v313_v22 = vmul.f32 0.1, %v484_v21 }
  0x3c   :  { %v252_v46 = vmax.f32 %v251_v44, 0.0  ;;  %v258_v47 = vmax.f32 %v257_v45, 0.0 }
  0x3d   :  { %v470_v23 = vround.rtne.f32 %v313_v22 }
  0x3e   :  { %v253_v48 = vmin.f32 %v252_v46, 128.0  ;;  %v259_v49 = vmin.f32 %v258_v47, 128.0 }
  0x3f   :  { %v315_v25 = vmax.f32 %v470_v23, 1.0 }
  0x40   :  { %v586_v50 = vtrunc.f32 %v253_v48  ;;  %v588_v51 = vtrunc.f32 %v259_v49 }
  0x41   :  { %v471_v27 = vtrunc.f32 %v315_v25 }
  0x42   :  { %v467_v52 = vcvt.f32.s32 %v586_v50  ;;  %v469_v53 = vcvt.f32.s32 %v588_v51 }
  0x43   :  { %v472_v30 = vcvt.f32.s32 %v471_v27 }
  0x44   :  { %262 = vperm.xlu0 %479, %v467_v52   ;;  %v351_v48 = vsub.s32 %v469_v53, %v467_v52 }
  0x46   :  { %v352_v49 = vcvt.s32.f32 %v351_v48 }
  0x48   :  { %267 = vperm.xlu0 %479, %v469_v53   ;;  %v353_v54 = vmul.f32 1e-08, %v352_v49 }
  0xc3   :  { %v596_v55 = vpop.permute.xlu0 %262 }
  0xc4   :  { %vm264_vm0 = vcmp.ge.s32.totalorder %v598_v56, %v596_v55  ;;  %vm265_vm2 = vcmp.ge.s32.totalorder %v601_v57, %v596_v55 }
  0xc7   :  { %v603_v58 = vpop.permute.xlu0 %267 }
  0xc8   :  { %vm269_vm1 = vcmp.lt.s32.totalorder %v598_v56, %v603_v58  ;;  %vm270_vm3 = vcmp.lt.s32.totalorder %v601_v57, %v603_v58 }
  0xc9   :  { %vm271_vm4 = vmand %vm264_vm0, %vm269_vm1 }
  0xca   :  { %vm272_vm5 = vmand %vm265_vm2, %vm270_vm3 }
 0x10a   :  { %v160_v59 = vpop.f32.mrb[0].mxu0 }
 0x10b   :  { %v236_v60 = vmul.f32 %v160_v59, %v160_v59  ;;  %v231_v61 = vpop.f32.mrb[0].mxu1  ;;  %v162_v62 = vpop.f32.mrb[1].mxu0 }
 0x10c   :  { %v238_v63 = vmul.f32 %v231_v61, %v231_v61  ;;  %v237_v1 = vmul.f32 %v162_v62, %v162_v62  ;;  %v233_v2 = vpop.f32.mrb[1].mxu1 }
 0x10d   :  { %v239_v3 = vmul.f32 %v233_v2, %v233_v2 }
 0x10e   :  { %v613_v4 = vadd.f32 %v238_v63, %v236_v60 }
 0x10f   :  { %v615_v5 = vadd.f32 %v239_v3, %v237_v1 }
 0x110   :  { %v276_v6 = vsel %vm271_vm4, %v613_v4, 0.0 }
 0x111   :  { %v277_v7 = vsel %vm272_vm5, %v615_v5, 0.0  ;;  %v273_v47 = vadd.f32 %v615_v5, %v613_v4 }
 0x112   :  { %v285_v8 = vmax.f32 %v276_v6, %v277_v7  ;;  %v278_v9 = vadd.f32 %v277_v7, %v276_v6 }
 0x114   :  { %286 = vmax.xlane.f32.xlu1 %v285_v8 }
 0x1a1   :  { %v287_v10 = vpop.xlane.xlu1 %286 }
 0x1a2   :  { %vm288_vm6 = vcmp.eq.f32.partialorder %v613_v4, %v287_v10  ;;  %vm289_vm7 = vcmp.eq.f32.partialorder %v615_v5, %v287_v10 }
 0x1a3   :  { %vm290_vm8 = vmand %vm271_vm4, %vm288_vm6 }
 0x1a4   :  { %vm291_vm9 = vmand %vm272_vm5, %vm289_vm7  ;;  %v292_v11 = vsel %vm290_vm8, %v598_v56, 256 }
 0x1a5   :  { %v293_v12 = vsel %vm291_vm9, %v601_v57, 256 }
 0x1a6   :  { %vm294_vm10 = vcmp.lt.s32.totalorder %v292_v11, %v293_v12 }
 0x1a7   :  { %v295_v13 = vsel %vm294_vm10, %v292_v11, %v293_v12 }
 0x1a8   :  { %v297_v14 = vshra.s32 %v295_v13, 16  ;;  %v296_v16 = vand.u32 65535, %v295_v13 }
 0x1aa   :  { %v299_v15 = vcvt.s32.f32 %v297_v14  ;;  %v298_v18 = vcvt.s32.f32 %v296_v16 }
 0x1ac   :  { %300 = vmin.xlane.f32.xlu1 %v299_v15 }
 0x239   :  { %v301_v17 = vpop.xlane.xlu1 %300 }
 0x23a   :  { %vm302_vm11 = vcmp.eq.f32.partialorder %v299_v15, %v301_v17  ;;  %v307_v26 = vcvt.f32.s32 %v301_v17 }
 0x23b   :  { %v303_v19 = vsel %vm302_vm11, %v298_v18, inf }
 0x23c   :  { %304 = vmin.xlane.f32.xlu0 %v303_v19  ;;  %v308_v29 = vshll.u32 %v307_v26, 16 }
 0x2c9   :  { %v305_v28 = vpop.xlane.xlu0 %304 }
 0x2ca   :  { %v306_v31 = vcvt.f32.s32 %v305_v28 }
 0x2cc   :  { %v309_v32 = vadd.s32 %v308_v29, %v306_v31 }
 0x2ce   :  { %v317_v33 = vsub.s32 %v309_v32, %v472_v30  ;;  %v321_v36 = vadd.s32 %v472_v30, %v309_v32 }
 0x2d0   :  { %vm318_vm12 = vcmp.lt.s32.totalorder %v317_v33, 0  ;;  %v319_v34 = vadd.s32 129, %v317_v33 }
 0x2d2   :  { %v320_v35 = vsel %vm318_vm12, %v319_v34, %v317_v33 }
 0x2d3   :  { %323 = vperm.xlu1 %480, %v320_v35  }
 0x2d7   :  { %334 = vperm.xlu1 %480, %v321_v36  }
 0x2fb   :  { %279 = vadd.xlane.f32.xlu1 %v278_v9 }
 0x352   :  { %v324_v24 = vpop.permute.xlu1 %323 }
 0x353   :  { %vm325_vm13 = vcmp.lt.s32.totalorder %v598_v56, %v324_v24  ;;  %vm326_vm14 = vcmp.lt.s32.totalorder %v601_v57, %v324_v24 }
 0x354   :  { %vm327_vm15 = vmand %vm264_vm0, %vm325_vm13  ;;  %vm363_vm0 = vcmask 7168  }
 0x355   :  { %vm328_vm4 = vmand %vm265_vm2, %vm326_vm14  ;;  %v398_v38 = vsel %vm327_vm15, 1.0, %v540_v0  ;;  %vm371_vm2 = vcmp.eq.s32.totalorder %v598_v56, 0 }
 0x356   :  { %v335_v37 = vpop.permute.xlu1 %334  ;;  %v399_v40 = vsel %vm328_vm4, 1.0, %v540_v0 }
 0x357   :  { %vm336_vm5 = vcmp.ge.s32.totalorder %v598_v56, %v335_v37  ;;  %vm337_vm6 = vcmp.ge.s32.totalorder %v601_v57, %v335_v37 }
 0x358   :  { %vm338_vm7 = vmand %vm336_vm5, %vm269_vm1  ;;  %vm372_vm1 = vcmp.eq.s32.totalorder %v598_v56, 1 }
 0x359   :  { %vm339_vm8 = vmand %vm337_vm6, %vm270_vm3  ;;  %v400_v39 = vsel %vm338_vm7, 1.0, %v540_v0 }
 0x35a   :  { %v401_v41 = vsel %vm339_vm8, 1.0, %v540_v0  ;;  %v344_v42 = vadd.f32 %v400_v39, %v398_v38 }
 0x35b   :  { %v345_v43 = vadd.f32 %v401_v41, %v399_v40 }
 0x35c   :  { %v346_v44 = vmul.f32 %v344_v42, %v613_v4 }
 0x35d   :  { %v347_v45 = vmul.f32 %v345_v43, %v615_v5 }
 0x35f   :  { %v348_v46 = vadd.f32 %v347_v45, %v346_v44 }
 0x361   :  { %349 = vadd.xlane.f32.xlu0 %v348_v46 }
 0x365   :  { %274 = vadd.xlane.f32.xlu0 %v273_v47 }
 0x388   :  { %v280_v0 = vpop.xlane.xlu1 %279 }
 0x389   :  { %v354_v55 = vadd.f32 %v353_v54, %v280_v0 }
 0x38b   :  { %485 = vrcp.f32 %v354_v55 }
 0x395   :  { %v486_v57 = vpop.eup %485 }
 0x3ee   :  { %v350_v58 = vpop.xlane.xlu0 %349 }
 0x3ef   :  { %v356_v59 = vmul.f32 %v486_v57, %v350_v58 }
 0x3f1   :  { %v364_v60 = vsel %vm363_vm0, %v356_v59, 0.0 }
 0x3f2   :  { %v365_v61 = vrot.slane %v364_v60, 4  ;;  %v275_v50 = vpop.xlane.xlu0 %274 }
 0x3f3   :  { %v282_v51 = vadd.f32 1e-08, %v275_v50  ;;  %v281_v53 = vsub.f32 %v275_v50, %v280_v0 }
 0x3f4   :  { %v366_v62 = vadd.f32 %v365_v61, %v364_v60 }
 0x3f5   :  { %487 = vrcp.f32 %v282_v51 }
 0x3f6   :  { %v367_v63 = vrot.slane %v366_v62, 2 }
 0x3f8   :  { %v368_v1 = vadd.f32 %v367_v63, %v366_v62 }
 0x3fa   :  { %v369_v2 = vrot.slane %v368_v1, 1 }
 0x3fc   :  { %v370_v3 = vadd.f32 %v369_v2, %v368_v1 }
 0x3fe   :  { %375 = vperm.xlu0 %479, %v370_v3  }
 0x3ff   :  { %v488_v52 = vpop.eup %487 }
 0x400   :  { %v284_v4 = vmul.f32 %v488_v52, %v281_v53 }
 0x402   :  { %v357_v5 = vrot.slane %v284_v4, 4 }
 0x404   :  { %v358_v6 = vadd.f32 %v357_v5, %v284_v4 }
 0x406   :  { %v359_v7 = vrot.slane %v358_v6, 2 }
 0x408   :  { %v360_v8 = vadd.f32 %v359_v7, %v358_v6 }
 0x40a   :  { %v361_v9 = vrot.slane %v360_v8, 1 }
 0x40c   :  { %v362_v11 = vadd.f32 %v361_v9, %v360_v8 }
 0x47d   :  { %v376_v10 = vpop.permute.xlu0 %375 }
 0x47e   :  { %v378_v12 = vsel %vm372_vm1, %v376_v10, 0.0 }
 0x47f   :  { %v379_v13 = vsel %vm371_vm2, %v362_v11, %v378_v12 }
 0x480   :  { %380 = vst [vmem:[#allocation5] sm:$0xff] %v379_v13 }
 0x481   :  { %522 = shalt.err (!%p519_p12)
}
 0x482   :  { %s523_s5 = scalar_lea.hbm %s681_s3, 128 }
 0x483   :  { %p524_p13 = scmp.ne.s32.totalorder %s681_s3, %s523_s5  ;;  %p527_p0 = scmp.lt.u32.totalorder %s523_s5, %s681_s3 }
 0x485   :  { %p529_p1 = pnand %p527_p0, %p524_p13 }
 0x487   :  { %532 = shalt.err (!%p529_p1)
}
 0x488   :  { %390 = dma.vmem_to_hbm [thread:$0]  %s388_s28, 128, %s681_s3, [#allocation4]  }
 0x489   :  { %535 = dma.done.wait [#allocation4], 128  }
 0x48a   :  { %536 = vsyncadd [#allocation4], 4294967168 }
 0x48b   :  { %394 = vsyncpa [#allocation3], 1 }
 0x48c   :  { %395 = vsyncpa [#allocation4], 1 }

</bundles_post_ra>
